<compile_context>
chip_gen: v5e
topology: v5e:2x2
jax: 0.10.0
libtpu: 0.0.40
codegen_flags: <defaults>
</compile_context>

<pallas_src>
import functools
import math

import jax
import jax.numpy as jnp
from jax.experimental import pallas as pl
from jax.experimental.pallas import tpu as pltpu

LN_EPS = 1e-5
NEG_INF = -1e9


# ---------------------------------------------------------------------------
# In-kernel helpers (f32 math)
# ---------------------------------------------------------------------------
def _layer_norm(x, gamma, beta):
    # x: (Tq, H) f32; gamma/beta: (1, H) f32
    mu = jnp.mean(x, axis=-1, keepdims=True)
    var = jnp.mean(jnp.square(x - mu), axis=-1, keepdims=True)
    return (x - mu) * jax.lax.rsqrt(var + LN_EPS) * gamma + beta


def _mha(xq, xkv, bias, wq, bq, wkv, bkv, wo, bo, *, nh, dk, dv, cdtype):
    """Multi-head attention (pre-residual output, f32).

    xq:  (Tq, H) cdtype   queries
    xkv: (S,  H) cdtype   keys/values source
    bias: (Tq, S) or (1, S) f32 additive mask (0 keep / -1e9 masked)
    wq: (H, nh*dk), wkv: (H, nh*dk + nh*dv), wo: (nh*dv, H)  -- cdtype
    bq/bkv/bo: f32 row biases.
    """
    Dh = nh * dk
    Dv = nh * dv
    q = jnp.dot(xq, wq, preferred_element_type=jnp.float32) + bq        # (Tq, Dh)
    kv = jnp.dot(xkv, wkv, preferred_element_type=jnp.float32) + bkv    # (S, Dh+Dv)
    k = kv[:, :Dh]
    v = kv[:, Dh:Dh + Dv]

    scale = jnp.float32(1.0 / math.sqrt(dk))
    tq_len = xq.shape[0]
    hidden = wo.shape[1]
    out = jnp.zeros((tq_len, hidden), jnp.float32)

    for h in range(nh):  # static unroll; per-head accumulation (no concat)
        qh = q[:, h * dk:(h + 1) * dk].astype(cdtype)   # (Tq, dk)
        kh = k[:, h * dk:(h + 1) * dk].astype(cdtype)   # (S, dk)
        vh = v[:, h * dv:(h + 1) * dv].astype(cdtype)   # (S, dv)
        # scores = qh @ kh^T without materializing the transpose
        s = jax.lax.dot_general(qh, kh, (((1,), (1,)), ((), ())),
                                preferred_element_type=jnp.float32)     # (Tq, S)
        s = s * scale + bias
        s = s - jnp.max(s, axis=-1, keepdims=True)
        p = jnp.exp(s)
        p = p * pl.reciprocal(jnp.sum(p, axis=-1, keepdims=True), approx=True)
        ctx = jnp.dot(p.astype(cdtype), vh,
                      preferred_element_type=jnp.float32)               # (Tq, dv)
        out = out + jnp.dot(ctx.astype(cdtype), wo[h * dv:(h + 1) * dv, :],
                            preferred_element_type=jnp.float32)         # (Tq, H)
    return out + bo


# ---------------------------------------------------------------------------
# Fused decoder-layer kernel (self-attn + cross-attn + FFN in one call)
# ---------------------------------------------------------------------------
def decoder_layer_kernel(nh, dk, dv, tq,
                         x_ref, xsrc_ref, causal_ref, tpad_ref, spad_ref,
                         swq_ref, sbq_ref, swkv_ref, sbkv_ref, swo_ref, sbo_ref,
                         sg_ref, sb_ref,
                         cwq_ref, cbq_ref, cwkv_ref, cbkv_ref, cwo_ref, cbo_ref,
                         cg_ref, cb_ref,
                         w1_ref, b1_ref, w2_ref, b2_ref, fg_ref, fb_ref,
                         out_ref):
    cdtype = x_ref.dtype
    qt = pl.program_id(1)
    q0 = pl.multiple_of(qt * tq, tq)

    x_full = x_ref[0]                              # (T, H)  layer input (keys/values)
    x_src = xsrc_ref[0]                            # (S, H)  encoder output
    x_tile = x_ref[0, pl.ds(q0, tq), :]            # (tq, H) query rows

    # ---- self-attention sublayer:  LN(x + MHA(x, x)) ----
    self_bias = causal_ref[...] + tpad_ref[0]      # (tq, T) f32 additive
    attn = _mha(x_tile, x_full, self_bias,
                swq_ref[...], sbq_ref[...], swkv_ref[...], sbkv_ref[...],
                swo_ref[...], sbo_ref[...], nh=nh, dk=dk, dv=dv, cdtype=cdtype)
    x1 = _layer_norm(x_tile.astype(jnp.float32) + attn, sg_ref[...], sb_ref[...])

    # ---- cross-attention sublayer:  LN(x1 + MHA(x1, x_src)) ----
    attn2 = _mha(x1.astype(cdtype), x_src, spad_ref[0],
                 cwq_ref[...], cbq_ref[...], cwkv_ref[...], cbkv_ref[...],
                 cwo_ref[...], cbo_ref[...], nh=nh, dk=dk, dv=dv, cdtype=cdtype)
    x2 = _layer_norm(x1 + attn2, cg_ref[...], cb_ref[...])

    # ---- feed-forward sublayer:  LN(x2 + W2 relu(W1 x2)) ----
    h = jnp.dot(x2.astype(cdtype), w1_ref[...],
                preferred_element_type=jnp.float32) + b1_ref[...]
    h = jnp.maximum(h, 0.0)
    y = jnp.dot(h.astype(cdtype), w2_ref[...],
                preferred_element_type=jnp.float32) + b2_ref[...]
    x3 = _layer_norm(x2 + y, fg_ref[...], fb_ref[...])

    out_ref[0] = x3.astype(out_ref.dtype)


def _layer_args(lp):
    s, c, f = lp["self"], lp["cross"], lp["ffn"]
    return (s["wq"], s["bq"], s["wkv"], s["bkv"], s["wo"], s["bo"], s["gamma"], s["beta"],
            c["wq"], c["bq"], c["wkv"], c["bkv"], c["wo"], c["bo"], c["gamma"], c["beta"],
            f["w1"], f["b1"], f["w2"], f["b2"], f["gamma"], f["beta"])


def decoder_layer(x, x_src, causal_bias, tgt_pad_bias, src_pad_bias, lp,
                  *, nh, dk, dv, tq):
    B, T, H = x.shape
    S = x_src.shape[1]
    assert T % tq == 0
    n_qt = T // tq
    layer_args = _layer_args(lp)
    kernel = functools.partial(decoder_layer_kernel, nh, dk, dv, tq)

    in_specs = [
        pl.BlockSpec((1, T, H), lambda b, t: (b, 0, 0)),    # X (full, for K/V)
        pl.BlockSpec((1, S, H), lambda b, t: (b, 0, 0)),    # X_src
        pl.BlockSpec((tq, T), lambda b, t: (t, 0)),         # causal bias rows
        pl.BlockSpec((1, 1, T), lambda b, t: (b, 0, 0)),    # tgt key-pad bias row
        pl.BlockSpec((1, 1, S), lambda b, t: (b, 0, 0)),    # src key-pad bias row
    ] + [pl.BlockSpec(a.shape, lambda b, t: (0, 0)) for a in layer_args]

    return pl.pallas_call(
        kernel,
        out_shape=jax.ShapeDtypeStruct((B, T, H), x.dtype),
        grid=(B, n_qt),
        in_specs=in_specs,
        out_specs=pl.BlockSpec((1, tq, H), lambda b, t: (b, t, 0)),
        compiler_params=pltpu.CompilerParams(
            dimension_semantics=("parallel", "parallel")),
    )(x, x_src, causal_bias, tgt_pad_bias, src_pad_bias, *layer_args)


# ---------------------------------------------------------------------------
# Parameter init (deterministic, synthetic)
# ---------------------------------------------------------------------------
def init_params(key, vocab_size, context_size, stack_size, num_heads,
                hidden_size, key_size, value_size, feedforward_size,
                dtype=jnp.bfloat16):
    Dh = num_heads * key_size
    Dv = num_heads * value_size

    def w(k, fi, fo):
        return (jax.random.normal(k, (fi, fo), jnp.float32) * 0.02).astype(dtype)

    def b(k, fo):
        return jax.random.normal(k, (1, fo), jnp.float32) * 0.02

    keys = jax.random.split(key, 2 + stack_size)
    params = {
        "emb": jax.random.normal(keys[0], (vocab_size, hidden_size), jnp.float32) * 0.02,
        "pos": jax.random.normal(keys[1], (context_size, hidden_size), jnp.float32) * 0.02,
        "layers": [],
    }
    for li in range(stack_size):
        lk = jax.random.split(keys[2 + li], 16)

        def attn(ks):
            return {
                "wq": w(ks[0], hidden_size, Dh), "bq": b(ks[1], Dh),
                "wkv": w(ks[2], hidden_size, Dh + Dv), "bkv": b(ks[3], Dh + Dv),
                "wo": w(ks[4], Dv, hidden_size), "bo": b(ks[5], hidden_size),
                "gamma": jnp.ones((1, hidden_size), jnp.float32),
                "beta": jnp.zeros((1, hidden_size), jnp.float32),
            }

        params["layers"].append({
            "self": attn(lk[0:6]),
            "cross": attn(lk[6:12]),
            "ffn": {
                "w1": w(lk[12], hidden_size, feedforward_size),
                "b1": b(lk[13], feedforward_size),
                "w2": w(lk[14], feedforward_size, hidden_size),
                "b2": b(lk[15], hidden_size),
                "gamma": jnp.ones((1, hidden_size), jnp.float32),
                "beta": jnp.zeros((1, hidden_size), jnp.float32),
            },
        })
    return params


# ---------------------------------------------------------------------------
# Full decoder forward
# ---------------------------------------------------------------------------
def transformer_decoder_forward(params, X_tgt, X_src, tgt_causal_mask,
                                tgt_key_padding_mask, src_key_padding_mask,
                                *, num_heads, key_size, value_size, q_block=None):
    B, T = X_tgt.shape
    S = X_src.shape[1]
    cdtype = params["layers"][0]["self"]["wq"].dtype

    # Embedding + positional encodings (plain-JAX gather glue).
    X = (params["emb"][X_tgt] + params["pos"][jnp.arange(T)][None, :, :]).astype(cdtype)
    Xs = X_src.astype(cdtype)

    # Tiny additive bias tensors (no (B, T, S) mask in HBM).
    causal_bias = jnp.where(tgt_causal_mask, NEG_INF, 0.0).astype(jnp.float32)         # (T, T)
    tgt_pad_bias = jnp.where(tgt_key_padding_mask, NEG_INF, 0.0
                             ).astype(jnp.float32)[:, None, :]                          # (B, 1, T)
    src_pad_bias = jnp.where(src_key_padding_mask, NEG_INF, 0.0
                             ).astype(jnp.float32)[:, None, :]                          # (B, 1, S)

    tq = q_block if q_block is not None else min(T, 128)

    for lp in params["layers"]:
        X = decoder_layer(X, Xs, causal_bias, tgt_pad_bias, src_pad_bias, lp,
                          nh=num_heads, dk=key_size, dv=value_size, tq=tq)
    return X


# ---------------------------------------------------------------------------
# Pure-JAX f32 reference (for validation)
# ---------------------------------------------------------------------------
def reference_forward(params, X_tgt, X_src, tgt_causal_mask,
                      tgt_key_padding_mask, src_key_padding_mask,
                      *, nh, dk, dv):
    f32 = jnp.float32
    T = X_tgt.shape[1]
    Dh, Dv = nh * dk, nh * dv
    X = params["emb"][X_tgt].astype(f32) + params["pos"][jnp.arange(T)].astype(f32)[None]
    Xs = X_src.astype(f32)
    self_bias = jnp.where(tgt_causal_mask[None] | tgt_key_padding_mask[:, None, :],
                          NEG_INF, 0.0).astype(f32)            # (B, T, T)
    cross_bias = jnp.where(src_key_padding_mask[:, None, :], NEG_INF, 0.0).astype(f32)

    def ln(x, g, b):
        mu = x.mean(-1, keepdims=True)
        var = ((x - mu) ** 2).mean(-1, keepdims=True)
        return (x - mu) * jax.lax.rsqrt(var + LN_EPS) * g + b

    def mha(xq, xkv, bias, p):
        q = xq @ p["wq"].astype(f32) + p["bq"]
        kv = xkv @ p["wkv"].astype(f32) + p["bkv"]
        k, v = kv[..., :Dh], kv[..., Dh:]
        Bb, Tq, _ = q.shape
        Ss = k.shape[1]
        qh = q.reshape(Bb, Tq, nh, dk).transpose(0, 2, 1, 3)
        kh = k.reshape(Bb, Ss, nh, dk).transpose(0, 2, 1, 3)
        vh = v.reshape(Bb, Ss, nh, dv).transpose(0, 2, 1, 3)
        s = jnp.einsum("bhtd,bhsd->bhts", qh, kh) / jnp.sqrt(f32(dk)) + bias[:, None]
        pr = jax.nn.softmax(s, axis=-1)
        ctx = jnp.einsum("bhts,bhsd->bhtd", pr, vh)
        ctx = ctx.transpose(0, 2, 1, 3).reshape(Bb, Tq, Dv)
        return ctx @ p["wo"].astype(f32) + p["bo"]

    for lp in params["layers"]:
        sp, cp, fp = lp["self"], lp["cross"], lp["ffn"]
        X = ln(X + mha(X, X, self_bias, sp), sp["gamma"], sp["beta"])
        X = ln(X + mha(X, Xs, cross_bias, cp), cp["gamma"], cp["beta"])
        h = jnp.maximum(X @ fp["w1"].astype(f32) + fp["b1"], 0.0)
        X = ln(X + h @ fp["w2"].astype(f32) + fp["b2"], fp["gamma"], fp["beta"])
    return X


# ---------------------------------------------------------------------------
if __name__ == "__main__":
    # Small, TPU-friendly configuration (H and nh*dk multiples of 128 lanes).
    vocab_size, context_size = 64, 32
    stack_size, num_heads = 2, 4
    hidden_size, key_size, value_size, feedforward_size = 128, 32, 32, 256
    B, T, S = 2, 16, 16

    root = jax.random.PRNGKey(0)
    kp, kt, ks = jax.random.split(root, 3)

    params = init_params(kp, vocab_size, context_size, stack_size, num_heads,
                         hidden_size, key_size, value_size, feedforward_size,
                         dtype=jnp.bfloat16)

    X_tgt = jax.random.randint(kt, (B, T), 0, vocab_size)                  # token ids
    X_src = jax.random.normal(ks, (B, S, hidden_size), jnp.float32)        # encoder output

    tgt_causal_mask = jnp.triu(jnp.ones((T, T), dtype=bool), k=1)          # True = masked
    tgt_key_padding_mask = jnp.zeros((B, T), dtype=bool).at[0, T - 1].set(True)
    src_key_padding_mask = jnp.zeros((B, S), dtype=bool).at[1, S - 1].set(True)

    out = transformer_decoder_forward(
        params, X_tgt, X_src, tgt_causal_mask,
        tgt_key_padding_mask, src_key_padding_mask,
        num_heads=num_heads, key_size=key_size, value_size=value_size,
        q_block=8)
    out = jax.block_until_ready(out)

    ref = reference_forward(params, X_tgt, X_src, tgt_causal_mask,
                            tgt_key_padding_mask, src_key_padding_mask,
                            nh=num_heads, dk=key_size, dv=value_size)
    ref = jax.block_until_ready(ref)

    out_f32 = out.astype(jnp.float32)
    assert out.shape == (B, T, hidden_size)
    assert bool(jnp.all(jnp.isfinite(out_f32)))
    max_err = float(jnp.max(jnp.abs(out_f32 - ref)))
    assert max_err < 0.35, f"max abs err vs reference = {max_err}"
    print("KERNEL_OK")
</pallas_src>

<mosaic_0001>
module attributes {stable_mosaic.version = 11 : i64} {
  func.func @decoder_layer_kernel(%arg0: i32, %arg1: i32, %arg2: memref<1x16x128xbf16, #tpu.memory_space<vmem>>, %arg3: memref<1x16x128xbf16, #tpu.memory_space<vmem>>, %arg4: memref<8x16xf32, #tpu.memory_space<vmem>>, %arg5: memref<1x1x16xf32, #tpu.memory_space<vmem>>, %arg6: memref<1x1x16xf32, #tpu.memory_space<vmem>>, %arg7: memref<128x128xbf16, #tpu.memory_space<vmem>>, %arg8: memref<1x128xf32, #tpu.memory_space<vmem>>, %arg9: memref<128x256xbf16, #tpu.memory_space<vmem>>, %arg10: memref<1x256xf32, #tpu.memory_space<vmem>>, %arg11: memref<128x128xbf16, #tpu.memory_space<vmem>>, %arg12: memref<1x128xf32, #tpu.memory_space<vmem>>, %arg13: memref<1x128xf32, #tpu.memory_space<vmem>>, %arg14: memref<1x128xf32, #tpu.memory_space<vmem>>, %arg15: memref<128x128xbf16, #tpu.memory_space<vmem>>, %arg16: memref<1x128xf32, #tpu.memory_space<vmem>>, %arg17: memref<128x256xbf16, #tpu.memory_space<vmem>>, %arg18: memref<1x256xf32, #tpu.memory_space<vmem>>, %arg19: memref<128x128xbf16, #tpu.memory_space<vmem>>, %arg20: memref<1x128xf32, #tpu.memory_space<vmem>>, %arg21: memref<1x128xf32, #tpu.memory_space<vmem>>, %arg22: memref<1x128xf32, #tpu.memory_space<vmem>>, %arg23: memref<128x256xbf16, #tpu.memory_space<vmem>>, %arg24: memref<1x256xf32, #tpu.memory_space<vmem>>, %arg25: memref<256x128xbf16, #tpu.memory_space<vmem>>, %arg26: memref<1x128xf32, #tpu.memory_space<vmem>>, %arg27: memref<1x128xf32, #tpu.memory_space<vmem>>, %arg28: memref<1x128xf32, #tpu.memory_space<vmem>>, %arg29: memref<1x8x128xbf16, #tpu.memory_space<vmem>>) attributes {dimension_semantics = [#tpu.dimension_semantics<parallel>, #tpu.dimension_semantics<parallel>], iteration_bounds = array<i64: 2, 2>, scalar_prefetch = 0 : i64, scratch_operands = 0 : i64, tpu.core_type = #tpu.core_type<tc>, window_params = [{transform_indices = @transform_0, window_bounds = array<i64: 1, 16, 128>}, {transform_indices = @transform_1, window_bounds = array<i64: 1, 16, 128>}, {transform_indices = @transform_2, window_bounds = array<i64: 8, 16>}, {transform_indices = @transform_3, window_bounds = array<i64: 1, 1, 16>}, {transform_indices = @transform_4, window_bounds = array<i64: 1, 1, 16>}, {pipeline_mode = #tpu.pipeline_mode<synchronous>, transform_indices = @transform_5, window_bounds = array<i64: 128, 128>}, {pipeline_mode = #tpu.pipeline_mode<synchronous>, transform_indices = @transform_6, window_bounds = array<i64: 1, 128>}, {pipeline_mode = #tpu.pipeline_mode<synchronous>, transform_indices = @transform_7, window_bounds = array<i64: 128, 256>}, {pipeline_mode = #tpu.pipeline_mode<synchronous>, transform_indices = @transform_8, window_bounds = array<i64: 1, 256>}, {pipeline_mode = #tpu.pipeline_mode<synchronous>, transform_indices = @transform_9, window_bounds = array<i64: 128, 128>}, {pipeline_mode = #tpu.pipeline_mode<synchronous>, transform_indices = @transform_10, window_bounds = array<i64: 1, 128>}, {pipeline_mode = #tpu.pipeline_mode<synchronous>, transform_indices = @transform_11, window_bounds = array<i64: 1, 128>}, {pipeline_mode = #tpu.pipeline_mode<synchronous>, transform_indices = @transform_12, window_bounds = array<i64: 1, 128>}, {pipeline_mode = #tpu.pipeline_mode<synchronous>, transform_indices = @transform_13, window_bounds = array<i64: 128, 128>}, {pipeline_mode = #tpu.pipeline_mode<synchronous>, transform_indices = @transform_14, window_bounds = array<i64: 1, 128>}, {pipeline_mode = #tpu.pipeline_mode<synchronous>, transform_indices = @transform_15, window_bounds = array<i64: 128, 256>}, {pipeline_mode = #tpu.pipeline_mode<synchronous>, transform_indices = @transform_16, window_bounds = array<i64: 1, 256>}, {pipeline_mode = #tpu.pipeline_mode<synchronous>, transform_indices = @transform_17, window_bounds = array<i64: 128, 128>}, {pipeline_mode = #tpu.pipeline_mode<synchronous>, transform_indices = @transform_18, window_bounds = array<i64: 1, 128>}, {pipeline_mode = #tpu.pipeline_mode<synchronous>, transform_indices = @transform_19, window_bounds = array<i64: 1, 128>}, {pipeline_mode = #tpu.pipeline_mode<synchronous>, transform_indices = @transform_20, window_bounds = array<i64: 1, 128>}, {pipeline_mode = #tpu.pipeline_mode<synchronous>, transform_indices = @transform_21, window_bounds = array<i64: 128, 256>}, {pipeline_mode = #tpu.pipeline_mode<synchronous>, transform_indices = @transform_22, window_bounds = array<i64: 1, 256>}, {pipeline_mode = #tpu.pipeline_mode<synchronous>, transform_indices = @transform_23, window_bounds = array<i64: 256, 128>}, {pipeline_mode = #tpu.pipeline_mode<synchronous>, transform_indices = @transform_24, window_bounds = array<i64: 1, 128>}, {pipeline_mode = #tpu.pipeline_mode<synchronous>, transform_indices = @transform_25, window_bounds = array<i64: 1, 128>}, {pipeline_mode = #tpu.pipeline_mode<synchronous>, transform_indices = @transform_26, window_bounds = array<i64: 1, 128>}, {transform_indices = @transform_27, window_bounds = array<i64: 1, 8, 128>}]} {
    %c8_i32 = arith.constant 8 : i32
    %0 = arith.muli %arg1, %c8_i32 : i32
    %1 = tpu.assume_multiple %0, 8 : i32
    %c0 = arith.constant 0 : index
    %c0_0 = arith.constant 0 : index
    %c0_1 = arith.constant 0 : index
    %2 = vector.load %arg2[%c0, %c0_0, %c0_1] : memref<1x16x128xbf16, #tpu.memory_space<vmem>>, vector<1x16x128xbf16>
    %3 = vector.shape_cast %2 : vector<1x16x128xbf16> to vector<16x128xbf16>
    %c0_2 = arith.constant 0 : index
    %c0_3 = arith.constant 0 : index
    %c0_4 = arith.constant 0 : index
    %4 = vector.load %arg3[%c0_2, %c0_3, %c0_4] : memref<1x16x128xbf16, #tpu.memory_space<vmem>>, vector<1x16x128xbf16>
    %5 = vector.shape_cast %4 : vector<1x16x128xbf16> to vector<16x128xbf16>
    %c0_5 = arith.constant 0 : index
    %6 = arith.index_cast %1 : i32 to index
    %c0_6 = arith.constant 0 : index
    %7 = vector.load %arg2[%c0_5, %6, %c0_6] : memref<1x16x128xbf16, #tpu.memory_space<vmem>>, vector<1x8x128xbf16>
    %8 = vector.shape_cast %7 : vector<1x8x128xbf16> to vector<8x128xbf16>
    %c0_7 = arith.constant 0 : index
    %c0_8 = arith.constant 0 : index
    %9 = vector.load %arg4[%c0_7, %c0_8] : memref<8x16xf32, #tpu.memory_space<vmem>>, vector<8x16xf32>
    %c0_9 = arith.constant 0 : index
    %c0_10 = arith.constant 0 : index
    %c0_11 = arith.constant 0 : index
    %10 = vector.load %arg5[%c0_9, %c0_10, %c0_11] : memref<1x1x16xf32, #tpu.memory_space<vmem>>, vector<1x1x16xf32>
    %11 = vector.shape_cast %10 : vector<1x1x16xf32> to vector<1x16xf32>
    %12 = vector.broadcast %11 : vector<1x16xf32> to vector<8x16xf32>
    %13 = arith.addf %9, %12 : vector<8x16xf32>
    %c0_12 = arith.constant 0 : index
    %c0_13 = arith.constant 0 : index
    %14 = vector.load %arg7[%c0_12, %c0_13] : memref<128x128xbf16, #tpu.memory_space<vmem>>, vector<128x128xbf16>
    %c0_14 = arith.constant 0 : index
    %c0_15 = arith.constant 0 : index
    %15 = vector.load %arg8[%c0_14, %c0_15] : memref<1x128xf32, #tpu.memory_space<vmem>>, vector<1x128xf32>
    %c0_16 = arith.constant 0 : index
    %c0_17 = arith.constant 0 : index
    %16 = vector.load %arg9[%c0_16, %c0_17] : memref<128x256xbf16, #tpu.memory_space<vmem>>, vector<128x256xbf16>
    %c0_18 = arith.constant 0 : index
    %c0_19 = arith.constant 0 : index
    %17 = vector.load %arg10[%c0_18, %c0_19] : memref<1x256xf32, #tpu.memory_space<vmem>>, vector<1x256xf32>
    %c0_20 = arith.constant 0 : index
    %c0_21 = arith.constant 0 : index
    %18 = vector.load %arg11[%c0_20, %c0_21] : memref<128x128xbf16, #tpu.memory_space<vmem>>, vector<128x128xbf16>
    %c0_22 = arith.constant 0 : index
    %c0_23 = arith.constant 0 : index
    %19 = vector.load %arg12[%c0_22, %c0_23] : memref<1x128xf32, #tpu.memory_space<vmem>>, vector<1x128xf32>
    %cst = arith.constant dense<0.000000e+00> : vector<8x128xf32>
    %20 = tpu.matmul %8, %14, %cst {dimension_numbers = #tpu.dot_dimension_numbers<[1], [0], [0], [1], [0, 0, 1, 1], [], []>} : vector<8x128xbf16>, vector<128x128xbf16>, vector<8x128xf32> -> vector<8x128xf32>
    %21 = vector.broadcast %15 : vector<1x128xf32> to vector<8x128xf32>
    %22 = arith.addf %20, %21 : vector<8x128xf32>
    %cst_24 = arith.constant dense<0.000000e+00> : vector<16x256xf32>
    %23 = tpu.matmul %3, %16, %cst_24 {dimension_numbers = #tpu.dot_dimension_numbers<[1], [0], [0], [1], [0, 0, 1, 1], [], []>} : vector<16x128xbf16>, vector<128x256xbf16>, vector<16x256xf32> -> vector<16x256xf32>
    %24 = vector.broadcast %17 : vector<1x256xf32> to vector<16x256xf32>
    %25 = arith.addf %23, %24 : vector<16x256xf32>
    %26 = vector.extract_strided_slice %25 {offsets = [0, 0], sizes = [16, 128], strides = [1, 1]} : vector<16x256xf32> to vector<16x128xf32>
    %27 = vector.extract_strided_slice %25 {offsets = [0, 128], sizes = [16, 128], strides = [1, 1]} : vector<16x256xf32> to vector<16x128xf32>
    %cst_25 = arith.constant 0.000000e+00 : f32
    %28 = vector.broadcast %cst_25 : f32 to vector<8x128xf32>
    %29 = vector.extract_strided_slice %22 {offsets = [0, 0], sizes = [8, 32], strides = [1, 1]} : vector<8x128xf32> to vector<8x32xf32>
    %30 = arith.truncf %29 : vector<8x32xf32> to vector<8x32xbf16>
    %31 = vector.extract_strided_slice %26 {offsets = [0, 0], sizes = [16, 32], strides = [1, 1]} : vector<16x128xf32> to vector<16x32xf32>
    %32 = arith.truncf %31 : vector<16x32xf32> to vector<16x32xbf16>
    %33 = vector.extract_strided_slice %27 {offsets = [0, 0], sizes = [16, 32], strides = [1, 1]} : vector<16x128xf32> to vector<16x32xf32>
    %34 = arith.truncf %33 : vector<16x32xf32> to vector<16x32xbf16>
    %cst_26 = arith.constant dense<0.000000e+00> : vector<8x16xf32>
    %35 = tpu.matmul %30, %32, %cst_26 {dimension_numbers = #tpu.dot_dimension_numbers<[1], [1], [0], [0], [0, 0, 1, 0], [], []>} : vector<8x32xbf16>, vector<16x32xbf16>, vector<8x16xf32> -> vector<8x16xf32>
    %cst_27 = arith.constant 0.176776692 : f32
    %36 = vector.broadcast %cst_27 : f32 to vector<8x16xf32>
    %37 = arith.mulf %35, %36 : vector<8x16xf32>
    %38 = arith.addf %37, %13 : vector<8x16xf32>
    %cst_28 = arith.constant dense<0xFF800000> : vector<8xf32>
    %39 = vector.multi_reduction <maximumf>, %38, %cst_28 [1] : vector<8x16xf32> to vector<8xf32>
    %40 = vector.shape_cast %39 : vector<8xf32> to vector<8x1xf32>
    %41 = vector.broadcast %40 : vector<8x1xf32> to vector<8x16xf32>
    %42 = arith.subf %38, %41 : vector<8x16xf32>
    %43 = math.exp %42 : vector<8x16xf32>
    %cst_29 = arith.constant dense<0.000000e+00> : vector<8xf32>
    %44 = vector.multi_reduction <add>, %43, %cst_29 [1] : vector<8x16xf32> to vector<8xf32>
    %45 = vector.shape_cast %44 : vector<8xf32> to vector<8x1xf32>
    %46 = tpu.reciprocal %45 {approx = true} : vector<8x1xf32> -> vector<8x1xf32>
    %47 = vector.broadcast %46 : vector<8x1xf32> to vector<8x16xf32>
    %48 = arith.mulf %43, %47 : vector<8x16xf32>
    %49 = arith.truncf %48 : vector<8x16xf32> to vector<8x16xbf16>
    %cst_30 = arith.constant dense<0.000000e+00> : vector<8x32xf32>
    %50 = tpu.matmul %49, %34, %cst_30 {dimension_numbers = #tpu.dot_dimension_numbers<[1], [0], [0], [1], [0, 0, 1, 1], [], []>} : vector<8x16xbf16>, vector<16x32xbf16>, vector<8x32xf32> -> vector<8x32xf32>
    %51 = arith.truncf %50 : vector<8x32xf32> to vector<8x32xbf16>
    %52 = vector.extract_strided_slice %18 {offsets = [0, 0], sizes = [32, 128], strides = [1, 1]} : vector<128x128xbf16> to vector<32x128xbf16>
    %cst_31 = arith.constant dense<0.000000e+00> : vector<8x128xf32>
    %53 = tpu.matmul %51, %52, %cst_31 {dimension_numbers = #tpu.dot_dimension_numbers<[1], [0], [0], [1], [0, 0, 1, 1], [], []>} : vector<8x32xbf16>, vector<32x128xbf16>, vector<8x128xf32> -> vector<8x128xf32>
    %54 = arith.addf %28, %53 : vector<8x128xf32>
    %55 = vector.extract_strided_slice %22 {offsets = [0, 32], sizes = [8, 32], strides = [1, 1]} : vector<8x128xf32> to vector<8x32xf32>
    %56 = arith.truncf %55 : vector<8x32xf32> to vector<8x32xbf16>
    %57 = vector.extract_strided_slice %26 {offsets = [0, 32], sizes = [16, 32], strides = [1, 1]} : vector<16x128xf32> to vector<16x32xf32>
    %58 = arith.truncf %57 : vector<16x32xf32> to vector<16x32xbf16>
    %59 = vector.extract_strided_slice %27 {offsets = [0, 32], sizes = [16, 32], strides = [1, 1]} : vector<16x128xf32> to vector<16x32xf32>
    %60 = arith.truncf %59 : vector<16x32xf32> to vector<16x32xbf16>
    %cst_32 = arith.constant dense<0.000000e+00> : vector<8x16xf32>
    %61 = tpu.matmul %56, %58, %cst_32 {dimension_numbers = #tpu.dot_dimension_numbers<[1], [1], [0], [0], [0, 0, 1, 0], [], []>} : vector<8x32xbf16>, vector<16x32xbf16>, vector<8x16xf32> -> vector<8x16xf32>
    %cst_33 = arith.constant 0.176776692 : f32
    %62 = vector.broadcast %cst_33 : f32 to vector<8x16xf32>
    %63 = arith.mulf %61, %62 : vector<8x16xf32>
    %64 = arith.addf %63, %13 : vector<8x16xf32>
    %cst_34 = arith.constant dense<0xFF800000> : vector<8xf32>
    %65 = vector.multi_reduction <maximumf>, %64, %cst_34 [1] : vector<8x16xf32> to vector<8xf32>
    %66 = vector.shape_cast %65 : vector<8xf32> to vector<8x1xf32>
    %67 = vector.broadcast %66 : vector<8x1xf32> to vector<8x16xf32>
    %68 = arith.subf %64, %67 : vector<8x16xf32>
    %69 = math.exp %68 : vector<8x16xf32>
    %cst_35 = arith.constant dense<0.000000e+00> : vector<8xf32>
    %70 = vector.multi_reduction <add>, %69, %cst_35 [1] : vector<8x16xf32> to vector<8xf32>
    %71 = vector.shape_cast %70 : vector<8xf32> to vector<8x1xf32>
    %72 = tpu.reciprocal %71 {approx = true} : vector<8x1xf32> -> vector<8x1xf32>
    %73 = vector.broadcast %72 : vector<8x1xf32> to vector<8x16xf32>
    %74 = arith.mulf %69, %73 : vector<8x16xf32>
    %75 = arith.truncf %74 : vector<8x16xf32> to vector<8x16xbf16>
    %cst_36 = arith.constant dense<0.000000e+00> : vector<8x32xf32>
    %76 = tpu.matmul %75, %60, %cst_36 {dimension_numbers = #tpu.dot_dimension_numbers<[1], [0], [0], [1], [0, 0, 1, 1], [], []>} : vector<8x16xbf16>, vector<16x32xbf16>, vector<8x32xf32> -> vector<8x32xf32>
    %77 = arith.truncf %76 : vector<8x32xf32> to vector<8x32xbf16>
    %78 = vector.extract_strided_slice %18 {offsets = [32, 0], sizes = [32, 128], strides = [1, 1]} : vector<128x128xbf16> to vector<32x128xbf16>
    %cst_37 = arith.constant dense<0.000000e+00> : vector<8x128xf32>
    %79 = tpu.matmul %77, %78, %cst_37 {dimension_numbers = #tpu.dot_dimension_numbers<[1], [0], [0], [1], [0, 0, 1, 1], [], []>} : vector<8x32xbf16>, vector<32x128xbf16>, vector<8x128xf32> -> vector<8x128xf32>
    %80 = arith.addf %54, %79 : vector<8x128xf32>
    %81 = vector.extract_strided_slice %22 {offsets = [0, 64], sizes = [8, 32], strides = [1, 1]} : vector<8x128xf32> to vector<8x32xf32>
    %82 = arith.truncf %81 : vector<8x32xf32> to vector<8x32xbf16>
    %83 = vector.extract_strided_slice %26 {offsets = [0, 64], sizes = [16, 32], strides = [1, 1]} : vector<16x128xf32> to vector<16x32xf32>
    %84 = arith.truncf %83 : vector<16x32xf32> to vector<16x32xbf16>
    %85 = vector.extract_strided_slice %27 {offsets = [0, 64], sizes = [16, 32], strides = [1, 1]} : vector<16x128xf32> to vector<16x32xf32>
    %86 = arith.truncf %85 : vector<16x32xf32> to vector<16x32xbf16>
    %cst_38 = arith.constant dense<0.000000e+00> : vector<8x16xf32>
    %87 = tpu.matmul %82, %84, %cst_38 {dimension_numbers = #tpu.dot_dimension_numbers<[1], [1], [0], [0], [0, 0, 1, 0], [], []>} : vector<8x32xbf16>, vector<16x32xbf16>, vector<8x16xf32> -> vector<8x16xf32>
    %cst_39 = arith.constant 0.176776692 : f32
    %88 = vector.broadcast %cst_39 : f32 to vector<8x16xf32>
    %89 = arith.mulf %87, %88 : vector<8x16xf32>
    %90 = arith.addf %89, %13 : vector<8x16xf32>
    %cst_40 = arith.constant dense<0xFF800000> : vector<8xf32>
    %91 = vector.multi_reduction <maximumf>, %90, %cst_40 [1] : vector<8x16xf32> to vector<8xf32>
    %92 = vector.shape_cast %91 : vector<8xf32> to vector<8x1xf32>
    %93 = vector.broadcast %92 : vector<8x1xf32> to vector<8x16xf32>
    %94 = arith.subf %90, %93 : vector<8x16xf32>
    %95 = math.exp %94 : vector<8x16xf32>
    %cst_41 = arith.constant dense<0.000000e+00> : vector<8xf32>
    %96 = vector.multi_reduction <add>, %95, %cst_41 [1] : vector<8x16xf32> to vector<8xf32>
    %97 = vector.shape_cast %96 : vector<8xf32> to vector<8x1xf32>
    %98 = tpu.reciprocal %97 {approx = true} : vector<8x1xf32> -> vector<8x1xf32>
    %99 = vector.broadcast %98 : vector<8x1xf32> to vector<8x16xf32>
    %100 = arith.mulf %95, %99 : vector<8x16xf32>
    %101 = arith.truncf %100 : vector<8x16xf32> to vector<8x16xbf16>
    %cst_42 = arith.constant dense<0.000000e+00> : vector<8x32xf32>
    %102 = tpu.matmul %101, %86, %cst_42 {dimension_numbers = #tpu.dot_dimension_numbers<[1], [0], [0], [1], [0, 0, 1, 1], [], []>} : vector<8x16xbf16>, vector<16x32xbf16>, vector<8x32xf32> -> vector<8x32xf32>
    %103 = arith.truncf %102 : vector<8x32xf32> to vector<8x32xbf16>
    %104 = vector.extract_strided_slice %18 {offsets = [64, 0], sizes = [32, 128], strides = [1, 1]} : vector<128x128xbf16> to vector<32x128xbf16>
    %cst_43 = arith.constant dense<0.000000e+00> : vector<8x128xf32>
    %105 = tpu.matmul %103, %104, %cst_43 {dimension_numbers = #tpu.dot_dimension_numbers<[1], [0], [0], [1], [0, 0, 1, 1], [], []>} : vector<8x32xbf16>, vector<32x128xbf16>, vector<8x128xf32> -> vector<8x128xf32>
    %106 = arith.addf %80, %105 : vector<8x128xf32>
    %107 = vector.extract_strided_slice %22 {offsets = [0, 96], sizes = [8, 32], strides = [1, 1]} : vector<8x128xf32> to vector<8x32xf32>
    %108 = arith.truncf %107 : vector<8x32xf32> to vector<8x32xbf16>
    %109 = vector.extract_strided_slice %26 {offsets = [0, 96], sizes = [16, 32], strides = [1, 1]} : vector<16x128xf32> to vector<16x32xf32>
    %110 = arith.truncf %109 : vector<16x32xf32> to vector<16x32xbf16>
    %111 = vector.extract_strided_slice %27 {offsets = [0, 96], sizes = [16, 32], strides = [1, 1]} : vector<16x128xf32> to vector<16x32xf32>
    %112 = arith.truncf %111 : vector<16x32xf32> to vector<16x32xbf16>
    %cst_44 = arith.constant dense<0.000000e+00> : vector<8x16xf32>
    %113 = tpu.matmul %108, %110, %cst_44 {dimension_numbers = #tpu.dot_dimension_numbers<[1], [1], [0], [0], [0, 0, 1, 0], [], []>} : vector<8x32xbf16>, vector<16x32xbf16>, vector<8x16xf32> -> vector<8x16xf32>
    %cst_45 = arith.constant 0.176776692 : f32
    %114 = vector.broadcast %cst_45 : f32 to vector<8x16xf32>
    %115 = arith.mulf %113, %114 : vector<8x16xf32>
    %116 = arith.addf %115, %13 : vector<8x16xf32>
    %cst_46 = arith.constant dense<0xFF800000> : vector<8xf32>
    %117 = vector.multi_reduction <maximumf>, %116, %cst_46 [1] : vector<8x16xf32> to vector<8xf32>
    %118 = vector.shape_cast %117 : vector<8xf32> to vector<8x1xf32>
    %119 = vector.broadcast %118 : vector<8x1xf32> to vector<8x16xf32>
    %120 = arith.subf %116, %119 : vector<8x16xf32>
    %121 = math.exp %120 : vector<8x16xf32>
    %cst_47 = arith.constant dense<0.000000e+00> : vector<8xf32>
    %122 = vector.multi_reduction <add>, %121, %cst_47 [1] : vector<8x16xf32> to vector<8xf32>
    %123 = vector.shape_cast %122 : vector<8xf32> to vector<8x1xf32>
    %124 = tpu.reciprocal %123 {approx = true} : vector<8x1xf32> -> vector<8x1xf32>
    %125 = vector.broadcast %124 : vector<8x1xf32> to vector<8x16xf32>
    %126 = arith.mulf %121, %125 : vector<8x16xf32>
    %127 = arith.truncf %126 : vector<8x16xf32> to vector<8x16xbf16>
    %cst_48 = arith.constant dense<0.000000e+00> : vector<8x32xf32>
    %128 = tpu.matmul %127, %112, %cst_48 {dimension_numbers = #tpu.dot_dimension_numbers<[1], [0], [0], [1], [0, 0, 1, 1], [], []>} : vector<8x16xbf16>, vector<16x32xbf16>, vector<8x32xf32> -> vector<8x32xf32>
    %129 = arith.truncf %128 : vector<8x32xf32> to vector<8x32xbf16>
    %130 = vector.extract_strided_slice %18 {offsets = [96, 0], sizes = [32, 128], strides = [1, 1]} : vector<128x128xbf16> to vector<32x128xbf16>
    %cst_49 = arith.constant dense<0.000000e+00> : vector<8x128xf32>
    %131 = tpu.matmul %129, %130, %cst_49 {dimension_numbers = #tpu.dot_dimension_numbers<[1], [0], [0], [1], [0, 0, 1, 1], [], []>} : vector<8x32xbf16>, vector<32x128xbf16>, vector<8x128xf32> -> vector<8x128xf32>
    %132 = arith.addf %106, %131 : vector<8x128xf32>
    %133 = vector.broadcast %19 : vector<1x128xf32> to vector<8x128xf32>
    %134 = arith.addf %132, %133 : vector<8x128xf32>
    %135 = arith.extf %8 : vector<8x128xbf16> to vector<8x128xf32>
    %136 = arith.addf %135, %134 : vector<8x128xf32>
    %c0_50 = arith.constant 0 : index
    %c0_51 = arith.constant 0 : index
    %137 = vector.load %arg13[%c0_50, %c0_51] : memref<1x128xf32, #tpu.memory_space<vmem>>, vector<1x128xf32>
    %c0_52 = arith.constant 0 : index
    %c0_53 = arith.constant 0 : index
    %138 = vector.load %arg14[%c0_52, %c0_53] : memref<1x128xf32, #tpu.memory_space<vmem>>, vector<1x128xf32>
    %cst_54 = arith.constant dense<0.000000e+00> : vector<8xf32>
    %139 = vector.multi_reduction <add>, %136, %cst_54 [1] : vector<8x128xf32> to vector<8xf32>
    %140 = vector.shape_cast %139 : vector<8xf32> to vector<8x1xf32>
    %cst_55 = arith.constant 1.280000e+02 : f32
    %141 = vector.broadcast %cst_55 : f32 to vector<8x1xf32>
    %142 = arith.divf %140, %141 : vector<8x1xf32>
    %143 = vector.broadcast %142 : vector<8x1xf32> to vector<8x128xf32>
    %144 = arith.subf %136, %143 : vector<8x128xf32>
    %145 = arith.mulf %144, %144 : vector<8x128xf32>
    %cst_56 = arith.constant dense<0.000000e+00> : vector<8xf32>
    %146 = vector.multi_reduction <add>, %145, %cst_56 [1] : vector<8x128xf32> to vector<8xf32>
    %147 = vector.shape_cast %146 : vector<8xf32> to vector<8x1xf32>
    %cst_57 = arith.constant 1.280000e+02 : f32
    %148 = vector.broadcast %cst_57 : f32 to vector<8x1xf32>
    %149 = arith.divf %147, %148 : vector<8x1xf32>
    %150 = vector.broadcast %142 : vector<8x1xf32> to vector<8x128xf32>
    %151 = arith.subf %136, %150 : vector<8x128xf32>
    %cst_58 = arith.constant 9.99999974E-6 : f32
    %152 = vector.broadcast %cst_58 : f32 to vector<8x1xf32>
    %153 = arith.addf %149, %152 : vector<8x1xf32>
    %154 = math.rsqrt %153 : vector<8x1xf32>
    %155 = vector.broadcast %154 : vector<8x1xf32> to vector<8x128xf32>
    %156 = arith.mulf %151, %155 : vector<8x128xf32>
    %157 = vector.broadcast %137 : vector<1x128xf32> to vector<8x128xf32>
    %158 = arith.mulf %156, %157 : vector<8x128xf32>
    %159 = vector.broadcast %138 : vector<1x128xf32> to vector<8x128xf32>
    %160 = arith.addf %158, %159 : vector<8x128xf32>
    %161 = arith.truncf %160 : vector<8x128xf32> to vector<8x128xbf16>
    %c0_59 = arith.constant 0 : index
    %c0_60 = arith.constant 0 : index
    %c0_61 = arith.constant 0 : index
    %162 = vector.load %arg6[%c0_59, %c0_60, %c0_61] : memref<1x1x16xf32, #tpu.memory_space<vmem>>, vector<1x1x16xf32>
    %163 = vector.shape_cast %162 : vector<1x1x16xf32> to vector<1x16xf32>
    %c0_62 = arith.constant 0 : index
    %c0_63 = arith.constant 0 : index
    %164 = vector.load %arg15[%c0_62, %c0_63] : memref<128x128xbf16, #tpu.memory_space<vmem>>, vector<128x128xbf16>
    %c0_64 = arith.constant 0 : index
    %c0_65 = arith.constant 0 : index
    %165 = vector.load %arg16[%c0_64, %c0_65] : memref<1x128xf32, #tpu.memory_space<vmem>>, vector<1x128xf32>
    %c0_66 = arith.constant 0 : index
    %c0_67 = arith.constant 0 : index
    %166 = vector.load %arg17[%c0_66, %c0_67] : memref<128x256xbf16, #tpu.memory_space<vmem>>, vector<128x256xbf16>
    %c0_68 = arith.constant 0 : index
    %c0_69 = arith.constant 0 : index
    %167 = vector.load %arg18[%c0_68, %c0_69] : memref<1x256xf32, #tpu.memory_space<vmem>>, vector<1x256xf32>
    %c0_70 = arith.constant 0 : index
    %c0_71 = arith.constant 0 : index
    %168 = vector.load %arg19[%c0_70, %c0_71] : memref<128x128xbf16, #tpu.memory_space<vmem>>, vector<128x128xbf16>
    %c0_72 = arith.constant 0 : index
    %c0_73 = arith.constant 0 : index
    %169 = vector.load %arg20[%c0_72, %c0_73] : memref<1x128xf32, #tpu.memory_space<vmem>>, vector<1x128xf32>
    %cst_74 = arith.constant dense<0.000000e+00> : vector<8x128xf32>
    %170 = tpu.matmul %161, %164, %cst_74 {dimension_numbers = #tpu.dot_dimension_numbers<[1], [0], [0], [1], [0, 0, 1, 1], [], []>} : vector<8x128xbf16>, vector<128x128xbf16>, vector<8x128xf32> -> vector<8x128xf32>
    %171 = vector.broadcast %165 : vector<1x128xf32> to vector<8x128xf32>
    %172 = arith.addf %170, %171 : vector<8x128xf32>
    %cst_75 = arith.constant dense<0.000000e+00> : vector<16x256xf32>
    %173 = tpu.matmul %5, %166, %cst_75 {dimension_numbers = #tpu.dot_dimension_numbers<[1], [0], [0], [1], [0, 0, 1, 1], [], []>} : vector<16x128xbf16>, vector<128x256xbf16>, vector<16x256xf32> -> vector<16x256xf32>
    %174 = vector.broadcast %167 : vector<1x256xf32> to vector<16x256xf32>
    %175 = arith.addf %173, %174 : vector<16x256xf32>
    %176 = vector.extract_strided_slice %175 {offsets = [0, 0], sizes = [16, 128], strides = [1, 1]} : vector<16x256xf32> to vector<16x128xf32>
    %177 = vector.extract_strided_slice %175 {offsets = [0, 128], sizes = [16, 128], strides = [1, 1]} : vector<16x256xf32> to vector<16x128xf32>
    %cst_76 = arith.constant 0.000000e+00 : f32
    %178 = vector.broadcast %cst_76 : f32 to vector<8x128xf32>
    %179 = vector.extract_strided_slice %172 {offsets = [0, 0], sizes = [8, 32], strides = [1, 1]} : vector<8x128xf32> to vector<8x32xf32>
    %180 = arith.truncf %179 : vector<8x32xf32> to vector<8x32xbf16>
    %181 = vector.extract_strided_slice %176 {offsets = [0, 0], sizes = [16, 32], strides = [1, 1]} : vector<16x128xf32> to vector<16x32xf32>
    %182 = arith.truncf %181 : vector<16x32xf32> to vector<16x32xbf16>
    %183 = vector.extract_strided_slice %177 {offsets = [0, 0], sizes = [16, 32], strides = [1, 1]} : vector<16x128xf32> to vector<16x32xf32>
    %184 = arith.truncf %183 : vector<16x32xf32> to vector<16x32xbf16>
    %cst_77 = arith.constant dense<0.000000e+00> : vector<8x16xf32>
    %185 = tpu.matmul %180, %182, %cst_77 {dimension_numbers = #tpu.dot_dimension_numbers<[1], [1], [0], [0], [0, 0, 1, 0], [], []>} : vector<8x32xbf16>, vector<16x32xbf16>, vector<8x16xf32> -> vector<8x16xf32>
    %cst_78 = arith.constant 0.176776692 : f32
    %186 = vector.broadcast %cst_78 : f32 to vector<8x16xf32>
    %187 = arith.mulf %185, %186 : vector<8x16xf32>
    %188 = vector.broadcast %163 : vector<1x16xf32> to vector<8x16xf32>
    %189 = arith.addf %187, %188 : vector<8x16xf32>
    %cst_79 = arith.constant dense<0xFF800000> : vector<8xf32>
    %190 = vector.multi_reduction <maximumf>, %189, %cst_79 [1] : vector<8x16xf32> to vector<8xf32>
    %191 = vector.shape_cast %190 : vector<8xf32> to vector<8x1xf32>
    %192 = vector.broadcast %191 : vector<8x1xf32> to vector<8x16xf32>
    %193 = arith.subf %189, %192 : vector<8x16xf32>
    %194 = math.exp %193 : vector<8x16xf32>
    %cst_80 = arith.constant dense<0.000000e+00> : vector<8xf32>
    %195 = vector.multi_reduction <add>, %194, %cst_80 [1] : vector<8x16xf32> to vector<8xf32>
    %196 = vector.shape_cast %195 : vector<8xf32> to vector<8x1xf32>
    %197 = tpu.reciprocal %196 {approx = true} : vector<8x1xf32> -> vector<8x1xf32>
    %198 = vector.broadcast %197 : vector<8x1xf32> to vector<8x16xf32>
    %199 = arith.mulf %194, %198 : vector<8x16xf32>
    %200 = arith.truncf %199 : vector<8x16xf32> to vector<8x16xbf16>
    %cst_81 = arith.constant dense<0.000000e+00> : vector<8x32xf32>
    %201 = tpu.matmul %200, %184, %cst_81 {dimension_numbers = #tpu.dot_dimension_numbers<[1], [0], [0], [1], [0, 0, 1, 1], [], []>} : vector<8x16xbf16>, vector<16x32xbf16>, vector<8x32xf32> -> vector<8x32xf32>
    %202 = arith.truncf %201 : vector<8x32xf32> to vector<8x32xbf16>
    %203 = vector.extract_strided_slice %168 {offsets = [0, 0], sizes = [32, 128], strides = [1, 1]} : vector<128x128xbf16> to vector<32x128xbf16>
    %cst_82 = arith.constant dense<0.000000e+00> : vector<8x128xf32>
    %204 = tpu.matmul %202, %203, %cst_82 {dimension_numbers = #tpu.dot_dimension_numbers<[1], [0], [0], [1], [0, 0, 1, 1], [], []>} : vector<8x32xbf16>, vector<32x128xbf16>, vector<8x128xf32> -> vector<8x128xf32>
    %205 = arith.addf %178, %204 : vector<8x128xf32>
    %206 = vector.extract_strided_slice %172 {offsets = [0, 32], sizes = [8, 32], strides = [1, 1]} : vector<8x128xf32> to vector<8x32xf32>
    %207 = arith.truncf %206 : vector<8x32xf32> to vector<8x32xbf16>
    %208 = vector.extract_strided_slice %176 {offsets = [0, 32], sizes = [16, 32], strides = [1, 1]} : vector<16x128xf32> to vector<16x32xf32>
    %209 = arith.truncf %208 : vector<16x32xf32> to vector<16x32xbf16>
    %210 = vector.extract_strided_slice %177 {offsets = [0, 32], sizes = [16, 32], strides = [1, 1]} : vector<16x128xf32> to vector<16x32xf32>
    %211 = arith.truncf %210 : vector<16x32xf32> to vector<16x32xbf16>
    %cst_83 = arith.constant dense<0.000000e+00> : vector<8x16xf32>
    %212 = tpu.matmul %207, %209, %cst_83 {dimension_numbers = #tpu.dot_dimension_numbers<[1], [1], [0], [0], [0, 0, 1, 0], [], []>} : vector<8x32xbf16>, vector<16x32xbf16>, vector<8x16xf32> -> vector<8x16xf32>
    %cst_84 = arith.constant 0.176776692 : f32
    %213 = vector.broadcast %cst_84 : f32 to vector<8x16xf32>
    %214 = arith.mulf %212, %213 : vector<8x16xf32>
    %215 = vector.broadcast %163 : vector<1x16xf32> to vector<8x16xf32>
    %216 = arith.addf %214, %215 : vector<8x16xf32>
    %cst_85 = arith.constant dense<0xFF800000> : vector<8xf32>
    %217 = vector.multi_reduction <maximumf>, %216, %cst_85 [1] : vector<8x16xf32> to vector<8xf32>
    %218 = vector.shape_cast %217 : vector<8xf32> to vector<8x1xf32>
    %219 = vector.broadcast %218 : vector<8x1xf32> to vector<8x16xf32>
    %220 = arith.subf %216, %219 : vector<8x16xf32>
    %221 = math.exp %220 : vector<8x16xf32>
    %cst_86 = arith.constant dense<0.000000e+00> : vector<8xf32>
    %222 = vector.multi_reduction <add>, %221, %cst_86 [1] : vector<8x16xf32> to vector<8xf32>
    %223 = vector.shape_cast %222 : vector<8xf32> to vector<8x1xf32>
    %224 = tpu.reciprocal %223 {approx = true} : vector<8x1xf32> -> vector<8x1xf32>
    %225 = vector.broadcast %224 : vector<8x1xf32> to vector<8x16xf32>
    %226 = arith.mulf %221, %225 : vector<8x16xf32>
    %227 = arith.truncf %226 : vector<8x16xf32> to vector<8x16xbf16>
    %cst_87 = arith.constant dense<0.000000e+00> : vector<8x32xf32>
    %228 = tpu.matmul %227, %211, %cst_87 {dimension_numbers = #tpu.dot_dimension_numbers<[1], [0], [0], [1], [0, 0, 1, 1], [], []>} : vector<8x16xbf16>, vector<16x32xbf16>, vector<8x32xf32> -> vector<8x32xf32>
    %229 = arith.truncf %228 : vector<8x32xf32> to vector<8x32xbf16>
    %230 = vector.extract_strided_slice %168 {offsets = [32, 0], sizes = [32, 128], strides = [1, 1]} : vector<128x128xbf16> to vector<32x128xbf16>
    %cst_88 = arith.constant dense<0.000000e+00> : vector<8x128xf32>
    %231 = tpu.matmul %229, %230, %cst_88 {dimension_numbers = #tpu.dot_dimension_numbers<[1], [0], [0], [1], [0, 0, 1, 1], [], []>} : vector<8x32xbf16>, vector<32x128xbf16>, vector<8x128xf32> -> vector<8x128xf32>
    %232 = arith.addf %205, %231 : vector<8x128xf32>
    %233 = vector.extract_strided_slice %172 {offsets = [0, 64], sizes = [8, 32], strides = [1, 1]} : vector<8x128xf32> to vector<8x32xf32>
    %234 = arith.truncf %233 : vector<8x32xf32> to vector<8x32xbf16>
    %235 = vector.extract_strided_slice %176 {offsets = [0, 64], sizes = [16, 32], strides = [1, 1]} : vector<16x128xf32> to vector<16x32xf32>
    %236 = arith.truncf %235 : vector<16x32xf32> to vector<16x32xbf16>
    %237 = vector.extract_strided_slice %177 {offsets = [0, 64], sizes = [16, 32], strides = [1, 1]} : vector<16x128xf32> to vector<16x32xf32>
    %238 = arith.truncf %237 : vector<16x32xf32> to vector<16x32xbf16>
    %cst_89 = arith.constant dense<0.000000e+00> : vector<8x16xf32>
    %239 = tpu.matmul %234, %236, %cst_89 {dimension_numbers = #tpu.dot_dimension_numbers<[1], [1], [0], [0], [0, 0, 1, 0], [], []>} : vector<8x32xbf16>, vector<16x32xbf16>, vector<8x16xf32> -> vector<8x16xf32>
    %cst_90 = arith.constant 0.176776692 : f32
    %240 = vector.broadcast %cst_90 : f32 to vector<8x16xf32>
    %241 = arith.mulf %239, %240 : vector<8x16xf32>
    %242 = vector.broadcast %163 : vector<1x16xf32> to vector<8x16xf32>
    %243 = arith.addf %241, %242 : vector<8x16xf32>
    %cst_91 = arith.constant dense<0xFF800000> : vector<8xf32>
    %244 = vector.multi_reduction <maximumf>, %243, %cst_91 [1] : vector<8x16xf32> to vector<8xf32>
    %245 = vector.shape_cast %244 : vector<8xf32> to vector<8x1xf32>
    %246 = vector.broadcast %245 : vector<8x1xf32> to vector<8x16xf32>
    %247 = arith.subf %243, %246 : vector<8x16xf32>
    %248 = math.exp %247 : vector<8x16xf32>
    %cst_92 = arith.constant dense<0.000000e+00> : vector<8xf32>
    %249 = vector.multi_reduction <add>, %248, %cst_92 [1] : vector<8x16xf32> to vector<8xf32>
    %250 = vector.shape_cast %249 : vector<8xf32> to vector<8x1xf32>
    %251 = tpu.reciprocal %250 {approx = true} : vector<8x1xf32> -> vector<8x1xf32>
    %252 = vector.broadcast %251 : vector<8x1xf32> to vector<8x16xf32>
    %253 = arith.mulf %248, %252 : vector<8x16xf32>
    %254 = arith.truncf %253 : vector<8x16xf32> to vector<8x16xbf16>
    %cst_93 = arith.constant dense<0.000000e+00> : vector<8x32xf32>
    %255 = tpu.matmul %254, %238, %cst_93 {dimension_numbers = #tpu.dot_dimension_numbers<[1], [0], [0], [1], [0, 0, 1, 1], [], []>} : vector<8x16xbf16>, vector<16x32xbf16>, vector<8x32xf32> -> vector<8x32xf32>
    %256 = arith.truncf %255 : vector<8x32xf32> to vector<8x32xbf16>
    %257 = vector.extract_strided_slice %168 {offsets = [64, 0], sizes = [32, 128], strides = [1, 1]} : vector<128x128xbf16> to vector<32x128xbf16>
    %cst_94 = arith.constant dense<0.000000e+00> : vector<8x128xf32>
    %258 = tpu.matmul %256, %257, %cst_94 {dimension_numbers = #tpu.dot_dimension_numbers<[1], [0], [0], [1], [0, 0, 1, 1], [], []>} : vector<8x32xbf16>, vector<32x128xbf16>, vector<8x128xf32> -> vector<8x128xf32>
    %259 = arith.addf %232, %258 : vector<8x128xf32>
    %260 = vector.extract_strided_slice %172 {offsets = [0, 96], sizes = [8, 32], strides = [1, 1]} : vector<8x128xf32> to vector<8x32xf32>
    %261 = arith.truncf %260 : vector<8x32xf32> to vector<8x32xbf16>
    %262 = vector.extract_strided_slice %176 {offsets = [0, 96], sizes = [16, 32], strides = [1, 1]} : vector<16x128xf32> to vector<16x32xf32>
    %263 = arith.truncf %262 : vector<16x32xf32> to vector<16x32xbf16>
    %264 = vector.extract_strided_slice %177 {offsets = [0, 96], sizes = [16, 32], strides = [1, 1]} : vector<16x128xf32> to vector<16x32xf32>
    %265 = arith.truncf %264 : vector<16x32xf32> to vector<16x32xbf16>
    %cst_95 = arith.constant dense<0.000000e+00> : vector<8x16xf32>
    %266 = tpu.matmul %261, %263, %cst_95 {dimension_numbers = #tpu.dot_dimension_numbers<[1], [1], [0], [0], [0, 0, 1, 0], [], []>} : vector<8x32xbf16>, vector<16x32xbf16>, vector<8x16xf32> -> vector<8x16xf32>
    %cst_96 = arith.constant 0.176776692 : f32
    %267 = vector.broadcast %cst_96 : f32 to vector<8x16xf32>
    %268 = arith.mulf %266, %267 : vector<8x16xf32>
    %269 = vector.broadcast %163 : vector<1x16xf32> to vector<8x16xf32>
    %270 = arith.addf %268, %269 : vector<8x16xf32>
    %cst_97 = arith.constant dense<0xFF800000> : vector<8xf32>
    %271 = vector.multi_reduction <maximumf>, %270, %cst_97 [1] : vector<8x16xf32> to vector<8xf32>
    %272 = vector.shape_cast %271 : vector<8xf32> to vector<8x1xf32>
    %273 = vector.broadcast %272 : vector<8x1xf32> to vector<8x16xf32>
    %274 = arith.subf %270, %273 : vector<8x16xf32>
    %275 = math.exp %274 : vector<8x16xf32>
    %cst_98 = arith.constant dense<0.000000e+00> : vector<8xf32>
    %276 = vector.multi_reduction <add>, %275, %cst_98 [1] : vector<8x16xf32> to vector<8xf32>
    %277 = vector.shape_cast %276 : vector<8xf32> to vector<8x1xf32>
    %278 = tpu.reciprocal %277 {approx = true} : vector<8x1xf32> -> vector<8x1xf32>
    %279 = vector.broadcast %278 : vector<8x1xf32> to vector<8x16xf32>
    %280 = arith.mulf %275, %279 : vector<8x16xf32>
    %281 = arith.truncf %280 : vector<8x16xf32> to vector<8x16xbf16>
    %cst_99 = arith.constant dense<0.000000e+00> : vector<8x32xf32>
    %282 = tpu.matmul %281, %265, %cst_99 {dimension_numbers = #tpu.dot_dimension_numbers<[1], [0], [0], [1], [0, 0, 1, 1], [], []>} : vector<8x16xbf16>, vector<16x32xbf16>, vector<8x32xf32> -> vector<8x32xf32>
    %283 = arith.truncf %282 : vector<8x32xf32> to vector<8x32xbf16>
    %284 = vector.extract_strided_slice %168 {offsets = [96, 0], sizes = [32, 128], strides = [1, 1]} : vector<128x128xbf16> to vector<32x128xbf16>
    %cst_100 = arith.constant dense<0.000000e+00> : vector<8x128xf32>
    %285 = tpu.matmul %283, %284, %cst_100 {dimension_numbers = #tpu.dot_dimension_numbers<[1], [0], [0], [1], [0, 0, 1, 1], [], []>} : vector<8x32xbf16>, vector<32x128xbf16>, vector<8x128xf32> -> vector<8x128xf32>
    %286 = arith.addf %259, %285 : vector<8x128xf32>
    %287 = vector.broadcast %169 : vector<1x128xf32> to vector<8x128xf32>
    %288 = arith.addf %286, %287 : vector<8x128xf32>
    %289 = arith.addf %160, %288 : vector<8x128xf32>
    %c0_101 = arith.constant 0 : index
    %c0_102 = arith.constant 0 : index
    %290 = vector.load %arg21[%c0_101, %c0_102] : memref<1x128xf32, #tpu.memory_space<vmem>>, vector<1x128xf32>
    %c0_103 = arith.constant 0 : index
    %c0_104 = arith.constant 0 : index
    %291 = vector.load %arg22[%c0_103, %c0_104] : memref<1x128xf32, #tpu.memory_space<vmem>>, vector<1x128xf32>
    %cst_105 = arith.constant dense<0.000000e+00> : vector<8xf32>
    %292 = vector.multi_reduction <add>, %289, %cst_105 [1] : vector<8x128xf32> to vector<8xf32>
    %293 = vector.shape_cast %292 : vector<8xf32> to vector<8x1xf32>
    %cst_106 = arith.constant 1.280000e+02 : f32
    %294 = vector.broadcast %cst_106 : f32 to vector<8x1xf32>
    %295 = arith.divf %293, %294 : vector<8x1xf32>
    %296 = vector.broadcast %295 : vector<8x1xf32> to vector<8x128xf32>
    %297 = arith.subf %289, %296 : vector<8x128xf32>
    %298 = arith.mulf %297, %297 : vector<8x128xf32>
    %cst_107 = arith.constant dense<0.000000e+00> : vector<8xf32>
    %299 = vector.multi_reduction <add>, %298, %cst_107 [1] : vector<8x128xf32> to vector<8xf32>
    %300 = vector.shape_cast %299 : vector<8xf32> to vector<8x1xf32>
    %cst_108 = arith.constant 1.280000e+02 : f32
    %301 = vector.broadcast %cst_108 : f32 to vector<8x1xf32>
    %302 = arith.divf %300, %301 : vector<8x1xf32>
    %303 = vector.broadcast %295 : vector<8x1xf32> to vector<8x128xf32>
    %304 = arith.subf %289, %303 : vector<8x128xf32>
    %cst_109 = arith.constant 9.99999974E-6 : f32
    %305 = vector.broadcast %cst_109 : f32 to vector<8x1xf32>
    %306 = arith.addf %302, %305 : vector<8x1xf32>
    %307 = math.rsqrt %306 : vector<8x1xf32>
    %308 = vector.broadcast %307 : vector<8x1xf32> to vector<8x128xf32>
    %309 = arith.mulf %304, %308 : vector<8x128xf32>
    %310 = vector.broadcast %290 : vector<1x128xf32> to vector<8x128xf32>
    %311 = arith.mulf %309, %310 : vector<8x128xf32>
    %312 = vector.broadcast %291 : vector<1x128xf32> to vector<8x128xf32>
    %313 = arith.addf %311, %312 : vector<8x128xf32>
    %314 = arith.truncf %313 : vector<8x128xf32> to vector<8x128xbf16>
    %c0_110 = arith.constant 0 : index
    %c0_111 = arith.constant 0 : index
    %315 = vector.load %arg23[%c0_110, %c0_111] : memref<128x256xbf16, #tpu.memory_space<vmem>>, vector<128x256xbf16>
    %cst_112 = arith.constant dense<0.000000e+00> : vector<8x256xf32>
    %316 = tpu.matmul %314, %315, %cst_112 {dimension_numbers = #tpu.dot_dimension_numbers<[1], [0], [0], [1], [0, 0, 1, 1], [], []>} : vector<8x128xbf16>, vector<128x256xbf16>, vector<8x256xf32> -> vector<8x256xf32>
    %c0_113 = arith.constant 0 : index
    %c0_114 = arith.constant 0 : index
    %317 = vector.load %arg24[%c0_113, %c0_114] : memref<1x256xf32, #tpu.memory_space<vmem>>, vector<1x256xf32>
    %318 = vector.broadcast %317 : vector<1x256xf32> to vector<8x256xf32>
    %319 = arith.addf %316, %318 : vector<8x256xf32>
    %cst_115 = arith.constant 0.000000e+00 : f32
    %320 = vector.broadcast %cst_115 : f32 to vector<8x256xf32>
    %321 = arith.maximumf %319, %320 : vector<8x256xf32>
    %322 = arith.truncf %321 : vector<8x256xf32> to vector<8x256xbf16>
    %c0_116 = arith.constant 0 : index
    %c0_117 = arith.constant 0 : index
    %323 = vector.load %arg25[%c0_116, %c0_117] : memref<256x128xbf16, #tpu.memory_space<vmem>>, vector<256x128xbf16>
    %cst_118 = arith.constant dense<0.000000e+00> : vector<8x128xf32>
    %324 = tpu.matmul %322, %323, %cst_118 {dimension_numbers = #tpu.dot_dimension_numbers<[1], [0], [0], [1], [0, 0, 1, 1], [], []>} : vector<8x256xbf16>, vector<256x128xbf16>, vector<8x128xf32> -> vector<8x128xf32>
    %c0_119 = arith.constant 0 : index
    %c0_120 = arith.constant 0 : index
    %325 = vector.load %arg26[%c0_119, %c0_120] : memref<1x128xf32, #tpu.memory_space<vmem>>, vector<1x128xf32>
    %326 = vector.broadcast %325 : vector<1x128xf32> to vector<8x128xf32>
    %327 = arith.addf %324, %326 : vector<8x128xf32>
    %328 = arith.addf %313, %327 : vector<8x128xf32>
    %c0_121 = arith.constant 0 : index
    %c0_122 = arith.constant 0 : index
    %329 = vector.load %arg27[%c0_121, %c0_122] : memref<1x128xf32, #tpu.memory_space<vmem>>, vector<1x128xf32>
    %c0_123 = arith.constant 0 : index
    %c0_124 = arith.constant 0 : index
    %330 = vector.load %arg28[%c0_123, %c0_124] : memref<1x128xf32, #tpu.memory_space<vmem>>, vector<1x128xf32>
    %cst_125 = arith.constant dense<0.000000e+00> : vector<8xf32>
    %331 = vector.multi_reduction <add>, %328, %cst_125 [1] : vector<8x128xf32> to vector<8xf32>
    %332 = vector.shape_cast %331 : vector<8xf32> to vector<8x1xf32>
    %cst_126 = arith.constant 1.280000e+02 : f32
    %333 = vector.broadcast %cst_126 : f32 to vector<8x1xf32>
    %334 = arith.divf %332, %333 : vector<8x1xf32>
    %335 = vector.broadcast %334 : vector<8x1xf32> to vector<8x128xf32>
    %336 = arith.subf %328, %335 : vector<8x128xf32>
    %337 = arith.mulf %336, %336 : vector<8x128xf32>
    %cst_127 = arith.constant dense<0.000000e+00> : vector<8xf32>
    %338 = vector.multi_reduction <add>, %337, %cst_127 [1] : vector<8x128xf32> to vector<8xf32>
    %339 = vector.shape_cast %338 : vector<8xf32> to vector<8x1xf32>
    %cst_128 = arith.constant 1.280000e+02 : f32
    %340 = vector.broadcast %cst_128 : f32 to vector<8x1xf32>
    %341 = arith.divf %339, %340 : vector<8x1xf32>
    %342 = vector.broadcast %334 : vector<8x1xf32> to vector<8x128xf32>
    %343 = arith.subf %328, %342 : vector<8x128xf32>
    %cst_129 = arith.constant 9.99999974E-6 : f32
    %344 = vector.broadcast %cst_129 : f32 to vector<8x1xf32>
    %345 = arith.addf %341, %344 : vector<8x1xf32>
    %346 = math.rsqrt %345 : vector<8x1xf32>
    %347 = vector.broadcast %346 : vector<8x1xf32> to vector<8x128xf32>
    %348 = arith.mulf %343, %347 : vector<8x128xf32>
    %349 = vector.broadcast %329 : vector<1x128xf32> to vector<8x128xf32>
    %350 = arith.mulf %348, %349 : vector<8x128xf32>
    %351 = vector.broadcast %330 : vector<1x128xf32> to vector<8x128xf32>
    %352 = arith.addf %350, %351 : vector<8x128xf32>
    %353 = arith.truncf %352 : vector<8x128xf32> to vector<8x128xbf16>
    %c0_130 = arith.constant 0 : index
    %c0_131 = arith.constant 0 : index
    %c0_132 = arith.constant 0 : index
    %354 = vector.load %arg29[%c0_130, %c0_131, %c0_132] : memref<1x8x128xbf16, #tpu.memory_space<vmem>>, vector<1x8x128xbf16>
    %355 = vector.shape_cast %354 : vector<1x8x128xbf16> to vector<8x128xbf16>
    %356 = vector.shape_cast %353 : vector<8x128xbf16> to vector<1x8x128xbf16>
    tpu.vector_store %arg29[%c0_130, %c0_131, %c0_132], %356 {strides = array<i32>} : memref<1x8x128xbf16, #tpu.memory_space<vmem>>, vector<1x8x128xbf16>,
    return
  }
  func.func @transform_0(%arg0: i32, %arg1: i32) -> (i32, i32, i32) {
    %c0_i32 = arith.constant 0 : i32
    %c0_i32_0 = arith.constant 0 : i32
    %c0_i32_1 = arith.constant 0 : i32
    return %arg0, %c0_i32, %c0_i32_0 : i32, i32, i32
  }
  func.func @transform_1(%arg0: i32, %arg1: i32) -> (i32, i32, i32) {
    %c0_i32 = arith.constant 0 : i32
    %c0_i32_0 = arith.constant 0 : i32
    %c0_i32_1 = arith.constant 0 : i32
    return %arg0, %c0_i32, %c0_i32_0 : i32, i32, i32
  }
  func.func @transform_2(%arg0: i32, %arg1: i32) -> (i32, i32) {
    %c0_i32 = arith.constant 0 : i32
    %c0_i32_0 = arith.constant 0 : i32
    return %arg1, %c0_i32 : i32, i32
  }
  func.func @transform_3(%arg0: i32, %arg1: i32) -> (i32, i32, i32) {
    %c0_i32 = arith.constant 0 : i32
    %c0_i32_0 = arith.constant 0 : i32
    %c0_i32_1 = arith.constant 0 : i32
    return %arg0, %c0_i32, %c0_i32_0 : i32, i32, i32
  }
  func.func @transform_4(%arg0: i32, %arg1: i32) -> (i32, i32, i32) {
    %c0_i32 = arith.constant 0 : i32
    %c0_i32_0 = arith.constant 0 : i32
    %c0_i32_1 = arith.constant 0 : i32
    return %arg0, %c0_i32, %c0_i32_0 : i32, i32, i32
  }
  func.func @transform_5(%arg0: i32, %arg1: i32) -> (i32, i32) {
    %c0_i32 = arith.constant 0 : i32
    %c0_i32_0 = arith.constant 0 : i32
    %c0_i32_1 = arith.constant 0 : i32
    return %c0_i32, %c0_i32_0 : i32, i32
  }
  func.func @transform_6(%arg0: i32, %arg1: i32) -> (i32, i32) {
    %c0_i32 = arith.constant 0 : i32
    %c0_i32_0 = arith.constant 0 : i32
    %c0_i32_1 = arith.constant 0 : i32
    return %c0_i32, %c0_i32_0 : i32, i32
  }
  func.func @transform_7(%arg0: i32, %arg1: i32) -> (i32, i32) {
    %c0_i32 = arith.constant 0 : i32
    %c0_i32_0 = arith.constant 0 : i32
    %c0_i32_1 = arith.constant 0 : i32
    return %c0_i32, %c0_i32_0 : i32, i32
  }
  func.func @transform_8(%arg0: i32, %arg1: i32) -> (i32, i32) {
    %c0_i32 = arith.constant 0 : i32
    %c0_i32_0 = arith.constant 0 : i32
    %c0_i32_1 = arith.constant 0 : i32
    return %c0_i32, %c0_i32_0 : i32, i32
  }
  func.func @transform_9(%arg0: i32, %arg1: i32) -> (i32, i32) {
    %c0_i32 = arith.constant 0 : i32
    %c0_i32_0 = arith.constant 0 : i32
    %c0_i32_1 = arith.constant 0 : i32
    return %c0_i32, %c0_i32_0 : i32, i32
  }
  func.func @transform_10(%arg0: i32, %arg1: i32) -> (i32, i32) {
    %c0_i32 = arith.constant 0 : i32
    %c0_i32_0 = arith.constant 0 : i32
    %c0_i32_1 = arith.constant 0 : i32
    return %c0_i32, %c0_i32_0 : i32, i32
  }
  func.func @transform_11(%arg0: i32, %arg1: i32) -> (i32, i32) {
    %c0_i32 = arith.constant 0 : i32
    %c0_i32_0 = arith.constant 0 : i32
    %c0_i32_1 = arith.constant 0 : i32
    return %c0_i32, %c0_i32_0 : i32, i32
  }
  func.func @transform_12(%arg0: i32, %arg1: i32) -> (i32, i32) {
    %c0_i32 = arith.constant 0 : i32
    %c0_i32_0 = arith.constant 0 : i32
    %c0_i32_1 = arith.constant 0 : i32
    return %c0_i32, %c0_i32_0 : i32, i32
  }
  func.func @transform_13(%arg0: i32, %arg1: i32) -> (i32, i32) {
    %c0_i32 = arith.constant 0 : i32
    %c0_i32_0 = arith.constant 0 : i32
    %c0_i32_1 = arith.constant 0 : i32
    return %c0_i32, %c0_i32_0 : i32, i32
  }
  func.func @transform_14(%arg0: i32, %arg1: i32) -> (i32, i32) {
    %c0_i32 = arith.constant 0 : i32
    %c0_i32_0 = arith.constant 0 : i32
    %c0_i32_1 = arith.constant 0 : i32
    return %c0_i32, %c0_i32_0 : i32, i32
  }
  func.func @transform_15(%arg0: i32, %arg1: i32) -> (i32, i32) {
    %c0_i32 = arith.constant 0 : i32
    %c0_i32_0 = arith.constant 0 : i32
    %c0_i32_1 = arith.constant 0 : i32
    return %c0_i32, %c0_i32_0 : i32, i32
  }
  func.func @transform_16(%arg0: i32, %arg1: i32) -> (i32, i32) {
    %c0_i32 = arith.constant 0 : i32
    %c0_i32_0 = arith.constant 0 : i32
    %c0_i32_1 = arith.constant 0 : i32
    return %c0_i32, %c0_i32_0 : i32, i32
  }
  func.func @transform_17(%arg0: i32, %arg1: i32) -> (i32, i32) {
    %c0_i32 = arith.constant 0 : i32
    %c0_i32_0 = arith.constant 0 : i32
    %c0_i32_1 = arith.constant 0 : i32
    return %c0_i32, %c0_i32_0 : i32, i32
  }
  func.func @transform_18(%arg0: i32, %arg1: i32) -> (i32, i32) {
    %c0_i32 = arith.constant 0 : i32
    %c0_i32_0 = arith.constant 0 : i32
    %c0_i32_1 = arith.constant 0 : i32
    return %c0_i32, %c0_i32_0 : i32, i32
  }
  func.func @transform_19(%arg0: i32, %arg1: i32) -> (i32, i32) {
    %c0_i32 = arith.constant 0 : i32
    %c0_i32_0 = arith.constant 0 : i32
    %c0_i32_1 = arith.constant 0 : i32
    return %c0_i32, %c0_i32_0 : i32, i32
  }
  func.func @transform_20(%arg0: i32, %arg1: i32) -> (i32, i32) {
    %c0_i32 = arith.constant 0 : i32
    %c0_i32_0 = arith.constant 0 : i32
    %c0_i32_1 = arith.constant 0 : i32
    return %c0_i32, %c0_i32_0 : i32, i32
  }
  func.func @transform_21(%arg0: i32, %arg1: i32) -> (i32, i32) {
    %c0_i32 = arith.constant 0 : i32
    %c0_i32_0 = arith.constant 0 : i32
    %c0_i32_1 = arith.constant 0 : i32
    return %c0_i32, %c0_i32_0 : i32, i32
  }
  func.func @transform_22(%arg0: i32, %arg1: i32) -> (i32, i32) {
    %c0_i32 = arith.constant 0 : i32
    %c0_i32_0 = arith.constant 0 : i32
    %c0_i32_1 = arith.constant 0 : i32
    return %c0_i32, %c0_i32_0 : i32, i32
  }
  func.func @transform_23(%arg0: i32, %arg1: i32) -> (i32, i32) {
    %c0_i32 = arith.constant 0 : i32
    %c0_i32_0 = arith.constant 0 : i32
    %c0_i32_1 = arith.constant 0 : i32
    return %c0_i32, %c0_i32_0 : i32, i32
  }
  func.func @transform_24(%arg0: i32, %arg1: i32) -> (i32, i32) {
    %c0_i32 = arith.constant 0 : i32
    %c0_i32_0 = arith.constant 0 : i32
    %c0_i32_1 = arith.constant 0 : i32
    return %c0_i32, %c0_i32_0 : i32, i32
  }
  func.func @transform_25(%arg0: i32, %arg1: i32) -> (i32, i32) {
    %c0_i32 = arith.constant 0 : i32
    %c0_i32_0 = arith.constant 0 : i32
    %c0_i32_1 = arith.constant 0 : i32
    return %c0_i32, %c0_i32_0 : i32, i32
  }
  func.func @transform_26(%arg0: i32, %arg1: i32) -> (i32, i32) {
    %c0_i32 = arith.constant 0 : i32
    %c0_i32_0 = arith.constant 0 : i32
    %c0_i32_1 = arith.constant 0 : i32
    return %c0_i32, %c0_i32_0 : i32, i32
  }
  func.func @transform_27(%arg0: i32, %arg1: i32) -> (i32, i32, i32) {
    %c0_i32 = arith.constant 0 : i32
    %c0_i32_0 = arith.constant 0 : i32
    return %arg0, %arg1, %c0_i32 : i32, i32, i32
  }
}

</mosaic_0001>

<bundles_post_ra>
// kernel: tpu_custom_call.1
= control target key start
LH: loop header
LB: loop body
LE: loop exit
PB: predicated region body
PF: predicated region fallthrough
CT: control target
= control target key end

     0   :  { %s5119_s0 = inlined_call_operand.hbm [shape: bf16[2,16,128], index: 0, kind: input, shape index: {}]   ;;  %s5120_s1 = inlined_call_operand.hbm [shape: bf16[2,16,128], index: 1, kind: input, shape index: {}]   ;;  %s5121_s2 = inlined_call_operand.hbm [shape: f32[16,16], index: 2, kind: input, shape index: {}]   ;;  %s5122_s3 = inlined_call_operand.vmem [shape: f32[2,1,16], index: 3, kind: input, shape index: {}]   ;;  %s5123_s4 = inlined_call_operand.hbm [shape: f32[2,1,16], index: 4, kind: input, shape index: {}]   ;;  %s5124_s5 = inlined_call_operand.hbm [shape: bf16[128,128], index: 5, kind: input, shape index: {}]   ;;  %s5125_s6 = inlined_call_operand.hbm [shape: f32[1,128], index: 6, kind: input, shape index: {}]   ;;  %s5126_s7 = inlined_call_operand.hbm [shape: bf16[128,256], index: 7, kind: input, shape index: {}]   ;;  %s5127_s8 = inlined_call_operand.vmem [shape: f32[1,256], index: 8, kind: input, shape index: {}]   ;;  %s5128_s9 = inlined_call_operand.hbm [shape: bf16[128,128], index: 9, kind: input, shape index: {}]   ;;  %s5129_s10 = inlined_call_operand.vmem [shape: f32[1,128], index: 10, kind: input, shape index: {}]   ;;  %s5130_s11 = inlined_call_operand.vmem [shape: f32[1,128], index: 11, kind: input, shape index: {}]   ;;  %s5131_s12 = inlined_call_operand.vmem [shape: f32[1,128], index: 12, kind: input, shape index: {}]   ;;  %s5132_s13 = inlined_call_operand.hbm [shape: bf16[128,128], index: 13, kind: input, shape index: {}]   ;;  %s5133_s14 = inlined_call_operand.vmem [shape: f32[1,128], index: 14, kind: input, shape index: {}]   ;;  %s5134_s15 = inlined_call_operand.hbm [shape: bf16[128,256], index: 15, kind: input, shape index: {}]   ;;  %s5135_s16 = inlined_call_operand.vmem [shape: f32[1,256], index: 16, kind: input, shape index: {}]   ;;  %s5136_s17 = inlined_call_operand.hbm [shape: bf16[128,128], index: 17, kind: input, shape index: {}]   ;;  %s5137_s18 = inlined_call_operand.vmem [shape: f32[1,128], index: 18, kind: input, shape index: {}]   ;;  %s5138_s19 = inlined_call_operand.vmem [shape: f32[1,128], index: 19, kind: input, shape index: {}]   ;;  %s5139_s20 = inlined_call_operand.vmem [shape: f32[1,128], index: 20, kind: input, shape index: {}]   ;;  %s5140_s21 = inlined_call_operand.hbm [shape: bf16[128,256], index: 21, kind: input, shape index: {}]   ;;  %s5141_s22 = inlined_call_operand.vmem [shape: f32[1,256], index: 22, kind: input, shape index: {}]   ;;  %s5142_s23 = inlined_call_operand.hbm [shape: bf16[256,128], index: 23, kind: input, shape index: {}]   ;;  %s5143_s24 = inlined_call_operand.vmem [shape: f32[1,128], index: 24, kind: input, shape index: {}]   ;;  %s5144_s25 = inlined_call_operand.vmem [shape: f32[1,128], index: 25, kind: input, shape index: {}]   ;;  %s5145_s26 = inlined_call_operand.vmem [shape: f32[1,128], index: 26, kind: input, shape index: {}]   ;;  %s5146_s27 = inlined_call_operand.hbm [shape: bf16[2,16,128], index: 27, kind: output, shape index: {}]  }
   0x1   :  { %5167 = sst [smem:[#allocation46_spill]] %s5119_s0 }
   0x2   :  { %5168 = sst [smem:[#allocation47_spill]] %s5120_s1 }
   0x3   :  { %5169 = sst [smem:[#allocation48_spill]] %s5121_s2 }
   0x4   :  { %5170 = sst [smem:[#allocation49_spill]] %s5122_s3 }
   0x5   :  { %5171 = sst [smem:[#allocation50_spill]] %s5123_s4 }
   0x6   :  { %5172 = sst [smem:[#allocation51_spill]] %s5124_s5 }
   0x7   :  { %5173 = sst [smem:[#allocation52_spill]] %s5125_s6 }
   0x8   :  { %5174 = sst [smem:[#allocation53_spill]] %s5126_s7 }
   0x9   :  { %5175 = sst [smem:[#allocation54_spill]] %s5127_s8 }
   0xa   :  { %5176 = sst [smem:[#allocation55_spill]] %s5128_s9 }
   0xb   :  { %5177 = sst [smem:[#allocation56_spill]] %s5129_s10 }
   0xc   :  { %5178 = sst [smem:[#allocation57_spill]] %s5130_s11 }
   0xd   :  { %5179 = sst [smem:[#allocation58_spill]] %s5131_s12 }
   0xe   :  { %5180 = sst [smem:[#allocation59_spill]] %s5132_s13 }
   0xf   :  { %5181 = sst [smem:[#allocation60_spill]] %s5133_s14 }
  0x10   :  { %5182 = sst [smem:[#allocation61_spill]] %s5134_s15 }
  0x11   :  { %5183 = sst [smem:[#allocation62_spill]] %s5135_s16 }
  0x12   :  { %5184 = sst [smem:[#allocation63_spill]] %s5136_s17 }
  0x13   :  { %5185 = sst [smem:[#allocation64_spill]] %s5137_s18 }
  0x14   :  { %5186 = sst [smem:[#allocation65_spill]] %s5138_s19 }
  0x15   :  { %5187 = sst [smem:[#allocation66_spill]] %s5139_s20 }
  0x16   :  { %5188 = sst [smem:[#allocation67_spill]] %s5140_s21 }
  0x17   :  { %5189 = sst [smem:[#allocation68_spill]] %s5141_s22 }
  0x18   :  { %5190 = sst [smem:[#allocation69_spill]] %s5142_s23 }
  0x19   :  { %5191 = sst [smem:[#allocation70_spill]] %s5143_s24 }
  0x1a   :  { %5192 = sst [smem:[#allocation71_spill]] %s5144_s25 }
  0x1b   :  { %5193 = sst [smem:[#allocation72_spill]] %s5145_s26 }
  0x1c   :  { %5194 = sst [smem:[#allocation73_spill]] %s5146_s27 }
  0x1d   :  { %32 = vsyncpa [#allocation3], 0 }
  0x1e   :  { %34 = vsyncpa [#allocation3 + $0x1], 0 }
  0x1f   :  { %35 = vsyncpa [#allocation6], 0 }
  0x20   :  { %37 = vsyncpa [#allocation6 + $0x1], 0 }
  0x21   :  { %38 = vsyncpa [#allocation9], 0 }
  0x22   :  { %40 = vsyncpa [#allocation9 + $0x1], 0 }
  0x23   :  { %41 = vsyncpa [#allocation12], 0 }
  0x24   :  { %42 = vsyncpa [#allocation15], 0 }
  0x25   :  { %43 = vsyncpa [#allocation18], 0 }
  0x26   :  { %44 = vsyncpa [#allocation21], 0 }
  0x27   :  { %45 = vsyncpa [#allocation4], 0 }
  0x28   :  { %47 = vsyncpa [#allocation4 + $0x1], 0  ;;  %s4539_s7 = smov 0   ;;  %s4541_s4 = smov 0  }
  0x29   :  { %s4543_s8 = smov 0   ;;  %s4545_s30 = smov 0  }
  0x2a   :  { %s4547_s9 = smov 0   ;;  %s4549_s5 = smov 0  }
  0x2b   :  { %s4551_s28 = smov 0   ;;  %s4553_s0 = smov 0  }
  0x2c   :  { %s4555_s10 = smov 0   ;;  %s4557_s29 = smov 0  }
  0x2d   :  { %s4559_s1 = smov 0   ;;  %s4561_s6 = smov 0  }
  0x2e   :  { %s4563_s11 = smov 0   ;;  %s4565_s2 = smov 0  }
  0x2f LB: > { %5195 = sst [smem:[#allocation34_spill]] %s4328_s7  ;;  %s4610_s3 = sadd.s32 4294967295, %s4380_s2   ;;  %s4380_s2 = sphi %s4565_s2, %s53_s2   ;;  %s4376_s11 = sphi %s4563_s11, %s5285_s11   ;;  %s4372_s6 = sphi %s4561_s6, %s5275_s6   ;;  %s4368_s1 = sphi %s4559_s1, %s5284_s1   ;;  %s4364_s29 = sphi %s4557_s29, %s5283_s29   ;;  %s4360_s10 = sphi %s4555_s10, %s5282_s10   ;;  %s4356_s0 = sphi %s4553_s0, %s5281_s0   ;;  %s4352_s28 = sphi %s4551_s28, %s5272_s28   ;;  %s4348_s5 = sphi %s4549_s5, %s5280_s5   ;;  %s4344_s9 = sphi %s4547_s9, %s5279_s9   ;;  %s4340_s30 = sphi %s4545_s30, %s5278_s30   ;;  %s4336_s8 = sphi %s4543_s8, %s5277_s8   ;;  %s4332_s4 = sphi %s4541_s4, %s5271_s4   ;;  %s4328_s7 = sphi %s4539_s7, %s5270_s7  }
  0x30   : > { %5196 = sst [smem:[#allocation35_spill]] %s4332_s4  ;;  %p2963_p0 = scmp.ge.s32.totalorder %s4380_s2, 1 }
  0x31   : > { %5197 = sst [smem:[#allocation36_spill]] %s4336_s8  ;;  %p5163_p1 = scmp.eq.s32.totalorder %s4610_s3, 0 }
  0x32   : > { %5198 = sst [smem:[#allocation37_spill]] %s4356_s0  ;;  %p690_p2 = scmp.lt.s32.totalorder %s4380_s2, 5 }
  0x33   : > { %5199 = sst [smem:[#allocation38_spill]] %s4364_s29  ;;  %s4382_s20 = smov [#allocation10]  }
  0x34   : > { %5200 = sst [smem:[#allocation39_spill]] %s4368_s1  ;;  %p4618_p3 = pnand %p2963_p0, %p690_p2 }
  0x35   : > { %5201 = sst [smem:[#allocation40_spill]] %s4372_s6  ;;  %s703_s19 = sshll.u32 %s4382_s20, 4  ;;  %s704_s19 = int_to_ptr.vmem [resolvable:$true] %s703_s19 }
  0x36   : > { %s5202_s25 = sld [smem:[#allocation51_spill]]  ;;  %p3565_p4 = pneg %p4618_p3 }
  0x37   : > { %s5203_s22 = scalar_select %p4618_p3, 1, 0 }
  0x38   : > { %p4626_p5 = pnand %p3565_p4, %p5163_p1  ;;  %s5206_s26 = sld [smem:[#allocation52_spill]] }
  0x39   : > { %5204 = sst [smem:[#allocation41_spill]] %s5203_s22  ;;  %s5155_s27 = smov 64  }
  0x3a   : > { %s5157_s12 = smov 4   ;;  %s4385_s20 = smov [#allocation11]  }
  0x3b   : > { %s718_s1 = sshll.u32 %s4385_s20, 4  ;;  %s5207_s7 = sld [smem:[#allocation55_spill]]  ;;  %s719_s1 = int_to_ptr.vmem [resolvable:$true] %s718_s1 }
  0x3c   : > { %s701_s24 = sshll.u32 %s5202_s25, 4  ;;  %s4386_s14 = smov [#allocation14]   ;;  %s702_s24 = int_to_ptr.hbm [resolvable:$true] %s701_s24 }
  0x3d   : > { %3568 = dma.hbm_to_vmem [thread:$0]  (!%p4626_p5), %s702_s24, 1024, %s704_s19, [#allocation9], %s5155_s27, %s5155_s27, %s5157_s12  }
  0x3e   : > { %s716_s25 = sshll.u32 %s5206_s26, 4  ;;  %s746_s16 = sshll.u32 %s4386_s14, 4  ;;  %s717_s25 = int_to_ptr.hbm [resolvable:$true] %s716_s25  ;;  %s747_s16 = int_to_ptr.vmem [resolvable:$true] %s746_s16 }
  0x3f   : > { %3571 = dma.hbm_to_vmem [thread:$0]  (!%p4626_p5), %s717_s25, 16, %s719_s1, [#allocation12]  }
  0x40   : > { %s5208_s15 = sld [smem:[#allocation61_spill]]  ;;  %s4387_s22 = smov [#allocation17]  }
  0x41   : > { %s744_s4 = sshll.u32 %s5207_s7, 4  ;;  %s786_s24 = sshll.u32 %s4387_s22, 4  ;;  %s745_s4 = int_to_ptr.hbm [resolvable:$true] %s744_s4  ;;  %s787_s24 = int_to_ptr.vmem [resolvable:$true] %s786_s24 }
  0x42   : > { %3577 = dma.hbm_to_vmem [thread:$0]  (!%p4626_p5), %s745_s4, 1024, %s747_s16, [#allocation15], %s5155_s27, %s5155_s27, %s5157_s12  }
  0x43   : > { %s5209_s21 = sld [smem:[#allocation67_spill]]  ;;  %s5153_s1 = smov 128  }
  0x44   : > { %s5154_s25 = smov 8   ;;  %s4390_s4 = smov [#allocation20]  }
  0x45   : > { %s826_s20 = sshll.u32 %s4390_s4, 4  ;;  %p79_p6 = scmp.ne.s32.totalorder %s4360_s10, %s4356_s0  ;;  %s827_s20 = int_to_ptr.vmem [resolvable:$true] %s826_s20 }
  0x46   : > { %s784_s19 = sshll.u32 %s5208_s15, 4  ;;  %p80_p7 = scmp.eq.s32.totalorder %s4380_s2, 0  ;;  %s785_s19 = int_to_ptr.hbm [resolvable:$true] %s784_s19 }
  0x47   : > { %3583 = dma.hbm_to_vmem [thread:$0]  (!%p4626_p5), %s785_s19, 2048, %s787_s24, [#allocation18], %s5153_s1, %s5153_s1, %s5154_s25  }
  0x48   : > { %p85_p8 = scmp.ne.s32.totalorder %s4356_s0, %s4352_s28  ;;  %p3619_p9 = scmp.lt.s32.totalorder %s4380_s2, 4 }
  0x49   : > { %s824_s8 = sshll.u32 %s5209_s21, 4  ;;  %p81_p10 = por %p80_p7, %p79_p6  ;;  %s825_s8 = int_to_ptr.hbm [resolvable:$true] %s824_s8 }
  0x4a   : > { %3589 = dma.hbm_to_vmem [thread:$0]  (!%p4626_p5), %s825_s8, 2048, %s827_s20, [#allocation21], %s5153_s1, %s5153_s1, %s5154_s25  }
  0x4b   : > { %s4674_s16 = sand.u32 1, %s4360_s10   ;;  %p4678_p11 = por %p5163_p1, %p85_p8 }
  0x4c   : > { %s2974_s19 = sshll.u32 %s4674_s16, 3  ;;  %s3419_s22 = sshll.u32 %s4376_s11, 3 }
  0x4d   : > { %s5210_s26 = scalar_select %p4678_p11, 1, 0 }
  0x4e   : > { %p4686_p12 = pnand %p3619_p9, %p81_p10  ;;  %s5162_s28 = sand.u32 1, %s4380_s2  }
  0x4f   : > { %5211 = sst [smem:[#allocation42_spill]] %s5210_s26  ;;  %s892_s20 = scalar_lea.vmem [#allocation5], %s2974_s19 }
  0x50   : > { %s5213_s8 = sld [smem:[#allocation47_spill]]  ;;  %s900_s14 = sshll.u32 %s892_s20, 4  ;;  %s901_s14 = int_to_ptr.vmem [resolvable:$true] %s900_s14 }
  0x51   : > { %s5214_s12 = sld [smem:[#allocation53_spill]]  ;;  %s4703_s21 = scalar_lea.sflag [#allocation6], %s5162_s28 }
  0x52   : > { %s5215_s26 = smov 4   ;;  %s5216_s0 = smov 64  }
  0x53   : > { %s4391_s7 = smov [#allocation13]   ;;  %s5217_s13 = sld [smem:[#allocation59_spill]] }
  0x54   : > { %s729_s29 = sshll.u32 %s4391_s7, 4  ;;  %s5219_s27 = smov 128   ;;  %s730_s29 = int_to_ptr.vmem [resolvable:$true] %s729_s29 }
  0x55   : > { %s5220_s17 = sld [smem:[#allocation63_spill]]  ;;  %s2962_s18 = sadd.s32 4294967294, %s4380_s2  }
  0x56   : > { %s897_s4 = scalar_lea.hbm %s5213_s8, %s3419_s22  ;;  %s4393_s8 = smov [#allocation19]  }
  0x57   : > { %s898_s1 = sshll.u32 %s897_s4, 4  ;;  %s727_s15 = sshll.u32 %s5214_s12, 4  ;;  %s899_s1 = int_to_ptr.hbm [resolvable:$true] %s898_s1  ;;  %s728_s15 = int_to_ptr.hbm [resolvable:$true] %s727_s15 }
  0x58   : > { %3599 = dma.hbm_to_vmem [thread:$0]  (!%p4686_p12), %s899_s1, 128, %s901_s14, %s4703_s21, %s5216_s0, %s5216_s0, %s5215_s26  }
  0x59   : > { %s767_s20 = sshll.u32 %s5217_s13, 4  ;;  %s5218_s12 = smov 8   ;;  %s768_s20 = int_to_ptr.hbm [resolvable:$true] %s767_s20 }
  0x5a   : > { %3574 = dma.hbm_to_vmem [thread:$0]  (!%p4626_p5), %s728_s15, 2048, %s730_s29, [#allocation12], %s5219_s27, %s5219_s27, %s5218_s12  }
  0x5b   : > { %s801_s1 = sshll.u32 %s5220_s17, 4  ;;  %s4392_s14 = smov [#allocation16]   ;;  %s802_s1 = int_to_ptr.hbm [resolvable:$true] %s801_s1 }
  0x5c   : > { %s769_s7 = sshll.u32 %s4392_s14, 4  ;;  %s803_s4 = sshll.u32 %s4393_s8, 4  ;;  %s770_s7 = int_to_ptr.vmem [resolvable:$true] %s769_s7  ;;  %s804_s4 = int_to_ptr.vmem [resolvable:$true] %s803_s4 }
  0x5d   : > { %3580 = dma.hbm_to_vmem [thread:$0]  (!%p4626_p5), %s768_s20, 1024, %s770_s7, [#allocation15], %s5216_s0, %s5216_s0, %s5215_s26  }
  0x5e   : > { %s5221_s23 = sld [smem:[#allocation69_spill]]  ;;  %s4394_s12 = smov [#allocation22]  }
  0x5f   : > { %3586 = dma.hbm_to_vmem [thread:$0]  (!%p4626_p5), %s802_s1, 1024, %s804_s4, [#allocation18], %s5216_s0, %s5216_s0, %s5215_s26  }
  0x60   : > { %s843_s20 = sshll.u32 %s4394_s12, 4  ;;  %s5222_s14 = sld [smem:[#allocation46_spill]]  ;;  %s844_s20 = int_to_ptr.vmem [resolvable:$true] %s843_s20 }
  0x61   : > { %s870_s8 = scalar_lea.vmem [#allocation2], %s2974_s19  ;;  %s5223_s15 = sld [smem:[#allocation36_spill]] }
  0x62   : > { %s878_s4 = sshll.u32 %s870_s8, 4  ;;  %s867_s29 = scalar_lea.sflag [#allocation3], %s4674_s16  ;;  %s879_s4 = int_to_ptr.vmem [resolvable:$true] %s878_s4 }
  0x63   : > { %s124_s19 = sadd.s32 1, %s4348_s5  ;;  %p131_p0 = scmp.ne.s32.totalorder %s4348_s5, %s4344_s9 }
  0x64   : > { %s841_s28 = sshll.u32 %s5221_s23, 4  ;;  %s5224_s12 = sld [smem:[#allocation35_spill]]  ;;  %s842_s28 = int_to_ptr.hbm [resolvable:$true] %s841_s28 }
  0x65   : > { %3592 = dma.hbm_to_vmem [thread:$0]  (!%p4626_p5), %s842_s28, 2048, %s844_s20, [#allocation21], %s5216_s0, %s5216_s0, %s5215_s26  }
  0x66   : > { %s875_s7 = scalar_lea.hbm %s5222_s14, %s3419_s22  ;;  %s62_s22 = sadd.s32 1, %s4372_s6 }
  0x67   : > { %s876_s1 = sshll.u32 %s875_s7, 4  ;;  %p63_p13 = scmp.ge.s32.totalorder %s62_s22, 2  ;;  %s877_s1 = int_to_ptr.hbm [resolvable:$true] %s876_s1 }
  0x68   : > { %3596 = dma.hbm_to_vmem [thread:$0]  (!%p4686_p12), %s877_s1, 128, %s879_s4, %s867_s29, %s5216_s0, %s5216_s0, %s5215_s26  }
  0x69   : > { %s65_s28 = sadd.s32 1, %s4376_s11  ;;  %s5287_s22 = smov (%p63_p13, %s62_s22), 0 }
  0x6a   : > { %5225 = sst [smem:[#allocation43_spill]] %s5287_s22  ;;  %s5289_s28 = smov (!%p63_p13, %s65_s28), %s4376_s11 }
  0x6b   : > { %s121_s20 = ssub.s32 %s4372_s6, %s5287_s22  ;;  %p4766_p2 = por %p131_p0, %p80_p7 }
  0x6c   : > { %s5227_s26 = sld [smem:[#allocation34_spill]]  ;;  %p67_p4 = scmp.ge.s32.totalorder %s5289_s28, 2 }
  0x6d   : > { %p122_p5 = scmp.eq.s32.totalorder %s121_s20, 0  ;;  %p137_p6 = scmp.ne.s32.totalorder %s4344_s9, %s4340_s30 }
  0x6e   : > { %s666_s27 = sadd.s32 1, %s5223_s15  ;;  %s5291_s28 = smov (%p67_p4, %s5289_s28), 0 }
  0x6f   : > { %5228 = sst [smem:[#allocation44_spill]] %s5291_s28  ;;  %s69_s14 = ssub.s32 %s4376_s11, %s5291_s28 }
  0x70   : > { %s4776_s25 = scalar_select %p122_p5, %s4348_s5, %s124_s19  }
  0x71   : > { %p4782_p8 = por %p137_p6, %p5163_p1  ;;  %p70_p7 = scmp.eq.s32.totalorder %s69_s14, 0 }
  0x72   : > { %s663_s1 = sor.u32 %s121_s20, %s69_s14  ;;  %p676_p13 = scmp.ne.s32.totalorder %s5223_s15, %s5224_s12 }
  0x73   : > { %p664_p10 = scmp.eq.s32.totalorder %s663_s1, 0  ;;  %s5230_s8 = sadd.s32 1, %s4360_s10 }
  0x74   : > { %s4791_s30 = scalar_select %p70_p7, %s4360_s10, %s5230_s8  }
  0x75   : > { %s5293_s15 = smov (!%p664_p10, %s5223_s15), %s666_s27  ;;  %p677_p0 = scmp.eq.s32.totalorder %s4610_s3, 3 }
  0x76   : > { %5231 = sst [smem:[#allocation45_spill]] %s4791_s30  ;;  %p682_p4 = scmp.ne.s32.totalorder %s5224_s12, %s5227_s26 }
  0x77   : > { %p683_p5 = scmp.eq.s32.totalorder %s2962_s18, 3  ;;  %s912_s4 = sand.u32 1, %s4348_s5  }
  0x78   : > { %p4800_p6 = por %p677_p0, %p676_p13  ;;  %s2980_s19 = sshll.u32 %s912_s4, 3 }
  0x79   : > { %p4804_p1 = por %p683_p5, %p682_p4  ;;  %s2981_s14 = sshll.u32 %s4372_s6, 3 }
  0x7a   : > { %s914_s27 = scalar_lea.vmem [#allocation7], %s2980_s19  ;;  %s5234_s12 = sld [smem:[#allocation48_spill]] }
  0x7b   : > { %s922_s1 = sshll.u32 %s914_s27, 4  ;;  %p3600_p7 = pnand %p3619_p9, %p4766_p2  ;;  %s923_s1 = int_to_ptr.vmem [resolvable:$true] %s922_s1 }
  0x7c   : > { %s5235_s23 = sld [smem:[#allocation50_spill]]  ;;  %s938_s22 = scalar_lea.vmem [#allocation8], %s4674_s16 }
  0x7d   : > { %s945_s6 = sshll.u32 %s938_s22, 4  ;;  %s5236_s19 = sand.u32 1, %s4380_s2   ;;  %s946_s6 = int_to_ptr.vmem [resolvable:$true] %s945_s6 }
  0x7e   : > { %s936_s27 = scalar_lea.sflag [#allocation9], %s5236_s19  ;;  %s5238_s0 = sld [smem:[#allocation37_spill]] (!%p4618_p3) }
  0x80   : > { %s918_s26 = scalar_lea.hbm %s5234_s12, %s2981_s14 }
  0x81   : > { %s920_s18 = sshll.u32 %s918_s26, 4  ;;  %954 = sbr.rel (%p4618_p3) target bundleno = 3944 (0xf68), region = 128  ;;  %s921_s18 = int_to_ptr.hbm [resolvable:$true] %s920_s18 }
  0x82   : > { %3602 = dma.hbm_to_vmem [thread:$0]  (!%p3600_p7), %s921_s18, 128, %s923_s1, %s4703_s21  }
  0x83   : > { %s941_s28 = scalar_lea.hbm %s5235_s23, %s4376_s11 }
  0x84   : > { %s943_s30 = sshll.u32 %s941_s28, 4  ;;  %s4829_s8 = sand.u32 (!%p4618_p3), 1, %s5238_s0   ;;  %s944_s30 = int_to_ptr.hbm [resolvable:$true] %s943_s30 }
  0x85   : > { %3605 = dma.hbm_to_vmem [thread:$0]  (!%p4686_p12), %s944_s30, 16, %s946_s6, %s936_s27  }
  0x86   : > { %s2983_s17 = sshll.u32 %s4829_s8, 3  ;;  %s957_s21 = scalar_lea.sflag [#allocation3], %s4829_s8 }
  0x87   : > { %s4833_s23 = scalar_lea.vmem [#allocation2], %s2983_s17 }
  0x88   : > { %4287 = dma.done.wait (%p4678_p11), %s957_s21, 128  }
  0x89   : > { %4289 = vsyncadd (%p4678_p11), %s957_s21, 4294967168  ;;  %s966_s6 = sand.u32 1, %s4610_s3   ;;  %s4840_s24 = scalar_lea.vmem [#allocation5], %s2983_s17 }
  0x8a   : > { %s967_s16 = scalar_lea.sflag [#allocation6], %s966_s6 }
  0x8b   : > { %4291 = dma.done.wait (%p4678_p11), %s967_s16, 128  }
  0x8c   : > { %4293 = vsyncadd (%p4678_p11), %s967_s16, 4294967168  ;;  %s978_s22 = sand.u32 1, %s4344_s9  }
  0x8d   : > { %s4847_s28 = sshll.u32 %s978_s22, 3 }
  0x8e   : > { %s980_s30 = scalar_lea.vmem [#allocation7], %s4847_s28 }
  0x8f   : > { %4295 = dma.done.wait (%p4782_p8), %s967_s16, 128  }
  0x90   : > { %4297 = vsyncadd (%p4782_p8), %s967_s16, 4294967168  ;;  %s987_s1 = scalar_lea.sflag [#allocation9], %s966_s6  ;;  %s989_s12 = scalar_lea.vmem [#allocation8], %s4829_s8 }
  0x91   : > { %4299 = dma.done.wait (%p4678_p11), %s987_s1, 16  }
  0x92   : > { %4301 = vsyncadd (%p4678_p11), %s987_s1, 4294967280  ;;  %p5240_p3 = scmp.eq.s32.totalorder %s4610_s3, 0 }
  0x94   : > { %4303 = dma.done.wait (%p5240_p3), [#allocation9], 1024   ;;  %p5241_p9 = pmov %p5240_p3 }
  0x95   : > { %p5242_p12 = pmov %p5240_p3 }
  0x96   : > { %4305 = vsyncadd (%p5241_p9), [#allocation9], 4294966272 }
  0x97   : > { %4307 = dma.done.wait (%p5242_p12), [#allocation12], 2064   ;;  %p5243_p2 = pmov %p5240_p3 }
  0x99   : > { %4309 = vsyncadd (%p5243_p2), [#allocation12], 4294965232  ;;  %p5244_p8 = pmov %p5243_p2 }
  0x9a   : > { %p5245_p10 = pmov %p5243_p2 }
  0x9b   : > { %4311 = dma.done.wait (%p5244_p8), [#allocation15], 2048  }
  0x9c   : > { %4313 = vsyncadd (%p5245_p10), [#allocation15], 4294965248  ;;  %p5246_p11 = pmov %p5243_p2 }
  0x9d   : > { %p5247_p13 = pmov %p5243_p2 }
  0x9e   : > { %4315 = dma.done.wait (%p5246_p11), [#allocation18], 3072  }
  0x9f   : > { %4317 = vsyncadd (%p5247_p13), [#allocation18], 4294964224  ;;  %p5248_p0 = pmov %p5243_p2 }
  0xa1   : > { %4319 = dma.done.wait (%p5248_p0), [#allocation21], 4096   ;;  %p5249_p4 = pmov %p5248_p0 }
  0xa2   : > { %v3092_v0 = vld [vmem:[#allocation13 + $0x70] sm:$0xf]  ;;  %v3446_v1 = vld [vmem:[#allocation13 + $0x74] sm:$0xf0]  ;;  %v3084_v2 = vld [vmem:[#allocation13 + $0x60] sm:$0xf] }
  0xa3   : > { %4321 = vsyncadd (%p5249_p4), [#allocation21], 4294963200  ;;  %v3093_v3 = vor.u32 %v3446_v1, %v3092_v0  ;;  %v3444_v4 = vld [vmem:[#allocation13 + $0x64] sm:$0xf0]  ;;  %v3430_v5 = vld [vmem:[#allocation10 + $0x38] sm:$0xff]  ;;  %s5250_s3 = sld [smem:[#allocation38_spill]] }
  0xa4   : > { %v3085_v6 = vor.u32 %v3444_v4, %v3084_v2  ;;  %1245 = vmatpush.bf16.msra.mxu0 %v3430_v5  ;;  %v3429_v7 = vld [vmem:[#allocation10 + $0x30] sm:$0xff]  ;;  %v3442_v9 = vld [vmem:[#allocation13 + $0x54] sm:$0xf0]  ;;  %v3428_v11 = vld [vmem:[#allocation10 + $0x28] sm:$0xff]  ;;  %s5251_s13 = sld [smem:[#allocation54_spill]]  ;;  %vm1380_vm0 = vcmask 261120  }
  0xa5   : > { %1349 = vmatpush.bf16.msra.mxu1 %v3093_v3  ;;  %v3076_v8 = vld [vmem:[#allocation13 + $0x50] sm:$0xf]  ;;  %v3068_v12 = vld [vmem:[#allocation13 + $0x40] sm:$0xf]  ;;  %v3440_v13 = vld [vmem:[#allocation13 + $0x44] sm:$0xf0] }
  0xa6   : > { %v3077_v10 = vor.u32 %v3442_v9, %v3076_v8  ;;  %v3445_v14 = vld [vmem:[#allocation13 + $0x74] sm:$0xf]  ;;  %v3094_v15 = vld [vmem:[#allocation13 + $0x78] sm:$0xf0]  ;;  %v3443_v16 = vld [vmem:[#allocation13 + $0x64] sm:$0xf]  ;;  %v3069_v19 = vor.u32 %v3440_v13, %v3068_v12 }
  0xa7   : > { %v3086_v17 = vld [vmem:[#allocation13 + $0x68] sm:$0xf0]  ;;  %v3097_v18 = vor.u32 %v3445_v14, %v3094_v15  ;;  %v3427_v20 = vld [vmem:[#allocation10 + $0x20] sm:$0xff]  ;;  %v3060_v21 = vld [vmem:[#allocation13 + $0x30] sm:$0xf]  ;;  %s5252_s0 = sld [smem:[#allocation39_spill]] }
  0xa8   : > { %1246 = vmatpush.bf16.msra.mxu0 %v3429_v7  ;;  %v3438_v22 = vld [vmem:[#allocation13 + $0x34] sm:$0xf0]  ;;  %v3089_v23 = vor.u32 %v3443_v16, %v3086_v17  ;;  %v3441_v24 = vld [vmem:[#allocation13 + $0x54] sm:$0xf]  ;;  %v3078_v25 = vld [vmem:[#allocation13 + $0x58] sm:$0xf0] }
  0xa9   : > { %1350 = vmatpush.bf16.msra.mxu1 %v3085_v6  ;;  %1363 = vmatpush.bf16.msra.mxu2 %v3097_v18  ;;  %v3052_v26 = vld [vmem:[#allocation13 + $0x20] sm:$0xf]  ;;  %v3436_v27 = vld [vmem:[#allocation13 + $0x24] sm:$0xf0]  ;;  %v3426_v28 = vld [vmem:[#allocation10 + $0x18] sm:$0xff]  ;;  %v3061_v29 = vor.u32 %v3438_v22, %v3060_v21  ;;  %v3081_v32 = vor.u32 %v3441_v24, %v3078_v25  ;;  %s2996_s7 = sshll.u32 %s5250_s3, 3 }
  0xaa   : > { %v3439_v30 = vld [vmem:[#allocation13 + $0x44] sm:$0xf]  ;;  %v3070_v31 = vld [vmem:[#allocation13 + $0x48] sm:$0xf0]  ;;  %v3053_v33 = vor.u32 %v3436_v27, %v3052_v26  ;;  %v3044_v35 = vld [vmem:[#allocation13 + $0x10] sm:$0xf] }
  0xab   : > { %v3425_v34 = vld [vmem:[#allocation10 + $0x10] sm:$0xff]  ;;  %v3434_v36 = vld [vmem:[#allocation13 + $0x14] sm:$0xf0]  ;;  %v3073_v37 = vor.u32 %v3439_v30, %v3070_v31  ;;  %v3062_v39 = vld [vmem:[#allocation13 + $0x38] sm:$0xf0]  ;;  %s1132_s26 = sshra.s32 %s2996_s7, 3 }
  0xac   : > { %1247 = vmatpush.bf16.msra.mxu0 %v3428_v11  ;;  %v3437_v38 = vld [vmem:[#allocation13 + $0x34] sm:$0xf]  ;;  %v3045_v40 = vor.u32 %v3434_v36, %v3044_v35  ;;  %v3424_v41 = vld [vmem:[#allocation10 + $0x8] sm:$0xff]  ;;  %v3036_v42 = vld [vmem:[#allocation13] sm:$0xf]  ;;  %s2997_s18 = sshll.u32 %s1132_s26, 2 }
  0xad   : > { %1351 = vmatpush.bf16.msra.mxu1 %v3077_v10  ;;  %1364 = vmatpush.bf16.msra.mxu2 %v3089_v23  ;;  %v3432_v43 = vld [vmem:[#allocation13 + $0x4] sm:$0xf0]  ;;  %v3065_v44 = vor.u32 %v3437_v38, %v3062_v39  ;;  %v3435_v45 = vld [vmem:[#allocation13 + $0x24] sm:$0xf]  ;;  %v3054_v46 = vld [vmem:[#allocation13 + $0x28] sm:$0xf0]  ;;  %s1135_s4 = scalar_lea.vmem %s4833_s23, %s2997_s18 [#allocation2] }
  0xae   : > { %v3037_v47 = vor.u32 %v3432_v43, %v3036_v42  ;;  %v3423_v48 = vld [vmem:[#allocation10] sm:$0xff]  ;;  %v3057_v49 = vor.u32 %v3435_v45, %v3054_v46  ;;  %v3433_v50 = vld [vmem:[#allocation13 + $0x14] sm:$0xf]  ;;  %v4882_v53 = vld [vmem:[%s1135_s4] sm:$0xf]  ;;  %s4395_s14 = smov 32  }
  0xaf   : > { %v3046_v51 = vld [vmem:[#allocation13 + $0x18] sm:$0xf0]  ;;  %v3421_v52 = vld [vmem:[%s4833_s23] sm:$0xff]  ;;  %v3431_v55 = vld [vmem:[#allocation13 + $0x4] sm:$0xf]  ;;  %s4396_s17 = smov 96  }
  0xb0   : > { %1248 = vmatpush.bf16.msra.mxu0 %v3427_v20  ;;  %v3049_v54 = vor.u32 %v3433_v50, %v3046_v51  ;;  %v3038_v56 = vld [vmem:[#allocation13 + $0x8] sm:$0xf0]  ;;  %v3759_v2 = vld [vmem:[#allocation11] ss:$0 sm:$0xff]  ;;  %p1123_p5 = scmp.lt.s32.totalorder %s5252_s0, 1  ;;  %s4397_s21 = smov 64  }
  0xb1   : > { %1352 = vmatpush.bf16.msra.mxu1 %v3069_v19  ;;  %1365 = vmatpush.bf16.msra.mxu2 %v3081_v32  ;;  %v3041_v57 = vor.u32 %v3431_v55, %v3038_v56  ;;  %v3448_v58 = vld [vmem:[#allocation14 + $0x8] sm:$0xff]  ;;  %s5253_s22 = sld [smem:[#allocation49_spill]]  ;;  %v3447_v8 = vld [vmem:[#allocation14] sm:$0xff]  ;;  %vm1402_vm1 = vcmask 130048  }
  0xb2   : > { %v1176_v61 = vld [vmem:[%s5251_s13] sm:$0x3]  ;;  %s1124_s23 = scalar_select %p1123_p5, %s5252_s0, 1 }
  0xb3   : > { %v1259_v62 = vperm.slane %v1176_v61, 0  ;;  %v1260_v10 = vperm.slane %v1176_v61, 1  ;;  %v1137_v20 = vld [vmem:[%s980_s30] sm:$0xff]  ;;  %s5254_s7 = sld [smem:[#allocation56_spill]] }
  0xb4   : > { %1249 = vmatpush.bf16.msra.mxu0 %v3426_v28  ;;  %s5255_s18 = sld [smem:[#allocation57_spill]] }
  0xb5   : > { %1353 = vmatpush.bf16.msra.mxu1 %v3061_v29  ;;  %1366 = vmatpush.bf16.msra.mxu2 %v3073_v37  ;;  %s5256_s27 = sld [smem:[#allocation58_spill]] }
  0xb6   : > { %s5257_s6 = sld [smem:[#allocation62_spill]] }
  0xb7   : > { %s1125_s1 = scalar_lea.vmem %s5253_s22, %s1124_s23  ;;  %s5260_s28 = sld [smem:[#allocation65_spill]] }
  0xb8   : > { %1250 = vmatpush.bf16.msra.mxu0 %v3425_v34  ;;  %v3760_v19 = vld [vmem:[%s1125_s1] ss:$0 sm:$0xff]  ;;  %s5258_s1 = sld [smem:[#allocation60_spill]] }
  0xb9   : > { %1354 = vmatpush.bf16.msra.mxu1 %v3053_v33  ;;  %1367 = vmatpush.bf16.msra.mxu2 %v3065_v44  ;;  %v1142_v21 = vadd.f32 %v3760_v19, %v1137_v20  ;;  %s5262_s4 = sld [smem:[#allocation68_spill]] }
  0xba   : > { %s5263_s13 = sld [smem:[#allocation70_spill]] }
  0xbb   : > { %s5264_s23 = sld [smem:[#allocation35_spill]] }
  0xbc   : > { %1251 = vmatpush.bf16.msra.mxu0 %v3424_v41  ;;  %s5266_s30 = sld [smem:[#allocation72_spill]] }
  0xbd   : > { %1355 = vmatpush.bf16.msra.mxu1 %v3045_v40  ;;  %1368 = vmatpush.bf16.msra.mxu2 %v3057_v49 }
  0xc0   : > { %1252 = vmatpush.bf16.msra.mxu0 %v3423_v48 }
  0xc1   : > { %1356 = vmatpush.bf16.msra.mxu1 %v3037_v47  ;;  %1369 = vmatpush.bf16.msra.mxu2 %v3049_v54  ;;  %s1120_s16 = sand.u32 1, %s5264_s23  }
  0xc2   : > { %s2703_s19 = scalar_lea.sflag [#allocation4], %s1120_s16 }
  0xc3   : > { %1253 = vmatmul.bf16.vlgmr.msra.gmra.mxu0 %v4882_v53 }
  0xc4   : > { %1357 = vmatmul.bf16.vlgmr.msra.gmra.mxu1 %v3421_v52 }
  0xc5   : > { %1370 = vmatpush.bf16.msra.mxu2 %v3041_v57 }
  0xc8   : > { %1371 = vmatmul.bf16.vlgmr.msra.gmra.mxu2 %v3421_v52 }
  0xc9   : > { %1541 = vmatpush.bf16.msrb.mxu2 %v3448_v58 }
  0xcd   : > { %1542 = vmatpush.bf16.msrb.mxu2 %v3447_v8 }
 0x140   : > { %v1254_v60 = vpop.f32.mrf.mxu0 }
 0x141   : > { %v1358_v59 = vpop.f32.mrf.mxu1  ;;  %v1255_v5 = vadd.f32 %v3759_v2, %v1254_v60 }
 0x142   : > { %v1359_v1 = vadd.f32 %v1358_v59, %v1259_v62 }
 0x143   : > { %v1377_v7 = vpack.c.bf16 %v1255_v5, %v1255_v5 }
 0x148   : > { %v1256_v0 = vpop.f32.mrf.mxu0 }
 0x149   : > { %v1360_v63 = vpop.f32.mrf.mxu1 }
 0x14a   : > { %v1361_v3 = vadd.f32 %v1360_v63, %v1259_v62 }
 0x14b   : > { %v1372_v9 = vpop.f32.mrf.mxu2 }
 0x14c   : > { %v1378_v4 = vpack.c.bf16 %v1361_v3, %v1359_v1  ;;  %v1373_v11 = vadd.f32 %v1372_v9, %v1260_v10 }
 0x14e   : > { %1636 = vrot.lane.b32.xlu2 %v1378_v4, %s4395_s14  ;;  %1436 = vrot.lane.b32.xlu1 %v1378_v4, %s4396_s17  ;;  %v1385_v6 = vsel %vm1380_vm0, %v1378_v4, 0 }
 0x14f   : > { %1394 = vmatpush.bf16.xpose.msra.mxu3 %v1385_v6 }
 0x153   : > { %v1374_v12 = vpop.f32.mrf.mxu2 }
 0x154   : > { %v1375_v13 = vadd.f32 %v1374_v12, %v1260_v10 }
 0x156   : > { %1550 = vrot.lane.b32.xlu2 %v1378_v4, %s4397_s21  ;;  %1433 = vrot.lane.b32.xlu1 %v1377_v7, %s4396_s17  ;;  %v4900_v14 = vpack.c.bf16 %v1375_v13, %v1373_v11 }
 0x157   : > { %3098 = vmatmul.msk.bf16.vlgmr.msra.gmra.mxu3 %vm1380_vm0, %v1377_v7 }
 0x158   : > { %1425 = vmatpush.bf16.msrb.mxu3 %v4900_v14 }
 0x15e   : > { %1548 = vrot.lane.b32.xlu1 %v1377_v7, %s4397_s21 }
 0x1a8   : > { %v1637_v15 = vpop.permute.xlu2 %1636 }
 0x1a9   : > { %v1642_v16 = vsel %vm1380_vm0, %v1637_v15, 0 }
 0x1aa   : > { %1651 = vmatpush.bf16.xpose.msra.mxu2 %v1642_v16 }
 0x1b0   : > { %v1551_v35 = vpop.permute.xlu2 %1550 }
 0x1b1   : > { %v1556_v37 = vsel %vm1380_vm0, %v1551_v35, 0  ;;  %v3452_v35 = vld [vmem:[#allocation14 + $0x28] sm:$0xff] }
 0x1c0   : > { %v1437_v17 = vpop.permute.xlu1 %1436 }
 0x1c1   : > { %v1442_v18 = vsel %vm1380_vm0, %v1437_v17, 0 }
 0x1c2   : > { %1451 = vmatpush.bf16.xpose.msra.mxu3 %v1442_v18  ;;  %v3450_v18 = vld [vmem:[#allocation14 + $0x18] sm:$0xff] }
 0x1c3   : > { %1513 = vmatpush.bf16.msrb.mxu1 %v3450_v18  ;;  %v3188_v18 = vld [vmem:[#allocation17 + $0x10] sm:$0xf] }
 0x1c8   : > { %v1434_v38 = vpop.permute.xlu1 %1433 }
 0x1d0   : > { %v1549_v39 = vpop.permute.xlu1 %1548 }
 0x1da   : > { %v1396_v22 = vpop.f32.mrf.mxu3 }
 0x1db   : > { %v1400_v23 = vmul.f32 0.17677669, %v1396_v22 }
 0x1dd   : > { %v1401_v24 = vadd.f32 %v1400_v23, %v1142_v21 }
 0x1df   : > { %v1403_v25 = vsel %vm1402_vm1, %v1401_v24, -inf }
 0x1e0   : > { %1404 = vmax.xlane.f32.xlu0 %v1403_v25 }
 0x1e2   : > { %v1398_v26 = vpop.f32.mrf.mxu3 }
 0x253   : > { %v1405_v27 = vpop.xlane.xlu0 %1404 }
 0x254   : > { %v1406_v28 = vsub.f32 %v1401_v24, %v1405_v27 }
 0x256   : > { %v1407_v29 = vmul.f32 1.442695, %v1406_v28 }
 0x258   : > { %3772 = vpow2.f32 %v1407_v29 }
 0x25e   : > { %v3773_v30 = vpop.eup %3772 }
 0x25f   : > { %v1409_v31 = vsel %vm1402_vm1, %v3773_v30, 0.0 }
 0x260   : > { %1410 = vadd.xlane.f32.xlu0 %v1409_v31 }
 0x274   : > { %1634 = vrot.lane.b32.xlu0 %v1377_v7, %s4395_s14 }
 0x2d3   : > { %v1411_v32 = vpop.xlane.xlu0 %1410 }
 0x2d4   : > { %3774 = vrcp.f32 %v1411_v32 }
 0x2da   : > { %v3775_v33 = vpop.eup %3774 }
 0x2db   : > { %v1413_v34 = vmul.f32 %v3775_v33, %v3773_v30  ;;  %v3454_v33 = vld [vmem:[#allocation14 + $0x38] sm:$0xff] }
 0x2dd   : > { %v1414_v36 = vpack.c.bf16 %v1413_v34, %v1413_v34  ;;  %v3453_v34 = vld [vmem:[#allocation14 + $0x30] sm:$0xff] }
 0x2df   : > { %3099 = vmatmul.msk.bf16.vlgmr.msrb.gmra.mxu3 %vm1402_vm1, %v1414_v36  ;;  %v3451_v36 = vld [vmem:[#allocation14 + $0x20] sm:$0xff] }
 0x2e0   : > { %1565 = vmatpush.bf16.xpose.msrb.mxu3 %v1556_v37 }
 0x2e6   : > { %v1635_v45 = vpop.permute.xlu0 %1634 }
 0x2ef   : > { %3100 = vmatmul.msk.bf16.vlgmr.msra.gmra.mxu3 %vm1380_vm0, %v1434_v38 }
 0x2ff   : > { %3120 = vmatmul.msk.bf16.vlgmr.msrb.gmra.mxu3 %vm1380_vm0, %v1549_v39 }
 0x362   : > { %v1427_v40 = vpop.f32.mrf.mxu3 }
 0x363   : > { %v1431_v41 = vpack.c.bf16 %v1427_v40, %v1427_v40 }
 0x365   : > { %3119 = vmatmul.msk.bf16.vlgmr.msrb.gmra.mxu2 %vm1380_vm0, %v1431_v41 }
 0x36a   : > { %v1429_v42 = vpop.f32.mrf.mxu3 }
 0x372   : > { %v1453_v43 = vpop.f32.mrf.mxu3 }
 0x373   : > { %v1457_v44 = vmul.f32 0.17677669, %v1453_v43 }
 0x375   : > { %3131 = vmatmul.msk.bf16.vlgmr.msra.gmra.mxu2 %vm1380_vm0, %v1635_v45  ;;  %v1458_v46 = vadd.f32 %v1457_v44, %v1142_v21 }
 0x377   : > { %v1459_v47 = vsel %vm1402_vm1, %v1458_v46, -inf }
 0x378   : > { %1460 = vmax.xlane.f32.xlu2 %v1459_v47 }
 0x37a   : > { %v1455_v48 = vpop.f32.mrf.mxu3 }
 0x382   : > { %v1567_v49 = vpop.f32.mrf.mxu3 }
 0x383   : > { %v1571_v50 = vmul.f32 0.17677669, %v1567_v49 }
 0x385   : > { %v1572_v51 = vadd.f32 %v1571_v50, %v1142_v21  ;;  %v3761_v50 = vld [vmem:[%s5254_s7] ss:$0 sm:$0xff] }
 0x387   : > { %v1573_v52 = vsel %vm1402_vm1, %v1572_v51, -inf }
 0x388   : > { %1574 = vmax.xlane.f32.xlu0 %v1573_v52 }
 0x38a   : > { %v1569_v54 = vpop.f32.mrf.mxu3 }
 0x39c   : > { %1671 = vrot.lane.b32.xlu0 %v4900_v14, %s4395_s14 }
 0x3e8   : > { %v4920_v55 = vpop.f32.mrf.mxu2 }
 0x3eb   : > { %v1461_v56 = vpop.xlane.xlu2 %1460 }
 0x3ec   : > { %v1462_v57 = vsub.f32 %v1458_v46, %v1461_v56 }
 0x3ee   : > { %v1463_v58 = vmul.f32 1.442695, %v1462_v57 }
 0x3f0   : > { %3776 = vpow2.f32 %v1463_v58  ;;  %v1546_v59 = vpop.f32.mrf.mxu2  ;;  %v4398_v58 = vmov 128.0  }
 0x3f1   : > { %v3236_v59 = vld [vmem:[#allocation17 + $0x70] sm:$0xf] }
 0x3f6   : > { %v3777_v60 = vpop.eup %3776 }
 0x3f7   : > { %v1465_v61 = vsel %vm1402_vm1, %v3777_v60, 0.0 }
 0x3f8   : > { %v1653_v62 = vpop.f32.mrf.mxu2  ;;  %1466 = vadd.xlane.f32.xlu2 %v1465_v61  ;;  %v3228_v61 = vld [vmem:[#allocation17 + $0x60] sm:$0xf] }
 0x3f9   : > { %v1657_v63 = vmul.f32 0.17677669, %v1653_v62 }
 0x3fb   : > { %v1575_v0 = vpop.xlane.xlu0 %1574  ;;  %v1658_v1 = vadd.f32 %v1657_v63, %v1142_v21  ;;  %v3449_v21 = vld [vmem:[#allocation14 + $0x10] sm:$0xff] }
 0x3fc   : > { %v1576_v2 = vsub.f32 %v1572_v51, %v1575_v0  ;;  %1514 = vmatpush.bf16.msrb.mxu1 %v3449_v21  ;;  %v1724_v51 = vunpack.c.l.bf16 %v4882_v53 }
 0x3fd   : > { %v1659_v3 = vsel %vm1402_vm1, %v1658_v1, -inf }
 0x3fe   : > { %v1577_v4 = vmul.f32 1.442695, %v1576_v2  ;;  %1660 = vmax.xlane.f32.xlu1 %v1659_v3  ;;  %v3474_v2 = vld [vmem:[#allocation17 + $0x54] sm:$0xf0] }
 0x3ff   : > { %v3462_v3 = vld [vmem:[#allocation16 + $0x38] sm:$0xff] }
 0x400   : > { %3778 = vpow2.f32 %v1577_v4  ;;  %v1655_v5 = vpop.f32.mrf.mxu2  ;;  %1626 = vmatpush.bf16.msra.mxu1 %v3452_v35  ;;  %v3455_v35 = vld [vmem:[#allocation16] sm:$0xff] }
 0x401   : > { %v3212_v5 = vld [vmem:[#allocation17 + $0x40] sm:$0xf] }
 0x404   : > { %1627 = vmatpush.bf16.msra.mxu1 %v3451_v36 }
 0x406   : > { %v3779_v6 = vpop.eup %3778 }
 0x407   : > { %v1579_v7 = vsel %vm1402_vm1, %v3779_v6, 0.0 }
 0x408   : > { %1580 = vadd.xlane.f32.xlu1 %v1579_v7 }
 0x40e   : > { %v1672_v8 = vpop.permute.xlu0 %1671 }
 0x40f   : > { %1684 = vmatpush.bf16.msra.mxu3 %v1672_v8 }
 0x410   : > { %1472 = vrot.lane.b32.xlu2 %v4900_v14, %s4396_s17 }
 0x46b   : > { %v1467_v9 = vpop.xlane.xlu2 %1466 }
 0x46c   : > { %3780 = vrcp.f32 %v1467_v9  ;;  %v3204_v9 = vld [vmem:[#allocation17 + $0x30] sm:$0xf] }
 0x471   : > { %v1661_v10 = vpop.xlane.xlu1 %1660 }
 0x472   : > { %v3781_v11 = vpop.eup %3780  ;;  %v1662_v12 = vsub.f32 %v1658_v1, %v1661_v10  ;;  %v3220_v1 = vld [vmem:[#allocation17 + $0x50] sm:$0xf]  ;;  %v3470_v10 = vld [vmem:[#allocation17 + $0x34] sm:$0xf0] }
 0x473   : > { %v1469_v13 = vmul.f32 %v3781_v11, %v3777_v60  ;;  %v1473_v15 = vpop.permute.xlu2 %1472  ;;  %v3478_v60 = vld [vmem:[#allocation17 + $0x74] sm:$0xf0]  ;;  %v3221_v53 = vor.u32 %v3474_v2, %v3220_v1  ;;  %v4975_v2 = vld [vmem:[%s989_s12] ss:$0 sm:$0xff] }
 0x474   : > { %v1663_v16 = vmul.f32 1.442695, %v1662_v12  ;;  %1485 = vmatpush.bf16.msrb.mxu0 %v1473_v15  ;;  %v3237_v62 = vor.u32 %v3478_v60, %v3236_v59  ;;  %v3205_v12 = vor.u32 %v3470_v10, %v3204_v9  ;;  %v3468_v15 = vld [vmem:[#allocation17 + $0x24] sm:$0xf0] }
 0x475   : > { %v1470_v17 = vpack.c.bf16 %v1469_v13, %v1469_v13  ;;  %v3196_v13 = vld [vmem:[#allocation17 + $0x20] sm:$0xf] }
 0x476   : > { %3782 = vpow2.f32 %v1663_v16  ;;  %1971 = vmatpush.bf16.msrb.mxu2 %v3237_v62  ;;  %v3764_v62 = vld [vmem:[%s5258_s1] ss:$0 sm:$0xff]  ;;  %s2995_s1 = sshll.u32 %s1120_s16, 2 }
 0x477   : > { %3101 = vmatmul.msk.bf16.vlgmr.msrb.gmra.mxu0 %vm1402_vm1, %v1470_v17  ;;  %v3197_v17 = vor.u32 %v3468_v15, %v3196_v13  ;;  %s1122_s26 = scalar_lea.vmem [#allocation23], %s2995_s1 }
 0x47b   : > { %v1581_v22 = vpop.xlane.xlu1 %1580 }
 0x47c   : > { %v3783_v19 = vpop.eup %3782 }
 0x47d   : > { %v1665_v20 = vsel %vm1402_vm1, %v3783_v19, 0.0 }
 0x47e   : > { %1666 = vadd.xlane.f32.xlu1 %v1665_v20 }
 0x497   : > { %1585 = vrot.lane.b32.xlu1 %v4900_v14, %s4397_s21 }
 0x4f1   : > { %v1667_v23 = vpop.xlane.xlu1 %1666 }
 0x4f2   : > { %3784 = vrcp.f32 %v1667_v23  ;;  %v3464_v23 = vld [vmem:[#allocation17 + $0x4] sm:$0xf0] }
 0x4f3   : > { %3786 = vrcp.f32 %v1581_v22  ;;  %v3180_v22 = vld [vmem:[#allocation17] sm:$0xf] }
 0x4f4   : > { %v1487_v24 = vpop.f32.mrf.mxu0  ;;  %3788 = vrcp.f32 %v4398_v58 }
 0x4f5   : > { %v1491_v25 = vpack.c.bf16 %v1487_v24, %v1487_v24 }
 0x4f7   : > { %3110 = vmatmul.msk.bf16.vlgmr.msrb.gmra.mxu1 %vm1380_vm0, %v1491_v25 }
 0x4f8   : > { %v3785_v26 = vpop.eup %3784  ;;  %1867 = vmatpush.bf16.msrb.mxu1 %v3462_v3  ;;  %v3477_v3 = vld [vmem:[#allocation17 + $0x74] sm:$0xf] }
 0x4f9   : > { %v1669_v27 = vmul.f32 %v3785_v26, %v3783_v19  ;;  %v3787_v30 = vpop.eup %3786  ;;  %v3466_v19 = vld [vmem:[#allocation17 + $0x14] sm:$0xf0]  ;;  %v3181_v26 = vor.u32 %v3464_v23, %v3180_v22  ;;  %v3206_v22 = vld [vmem:[#allocation17 + $0x38] sm:$0xf0] }
 0x4fa   : > { %v1583_v31 = vmul.f32 %v3787_v30, %v3779_v6  ;;  %v3789_v0 = vpop.eup %3788  ;;  %v3472_v6 = vld [vmem:[#allocation17 + $0x44] sm:$0xf0]  ;;  %v3189_v21 = vor.u32 %v3466_v19, %v3188_v18  ;;  %v3461_v30 = vld [vmem:[#allocation16 + $0x30] sm:$0xff] }
 0x4fb   : > { %v1670_v28 = vpack.c.bf16 %v1669_v27, %v1669_v27  ;;  %v1731_v4 = vmul.f32 128.0, %v3789_v0  ;;  %v3213_v8 = vor.u32 %v3472_v6, %v3212_v5  ;;  %vm1735_vm2 = vweird.f32 %v3789_v0 }
 0x4fc   : > { %v1489_v29 = vpop.f32.mrf.mxu0  ;;  %v1584_v14 = vpack.c.bf16 %v1583_v31, %v1583_v31  ;;  %1868 = vmatpush.bf16.msrb.mxu1 %v3461_v30  ;;  %v3460_v31 = vld [vmem:[#allocation16 + $0x28] sm:$0xff] }
 0x4fd   : > { %3132 = vmatmul.msk.bf16.vlgmr.msra.gmra.mxu3 %vm1402_vm1, %v1670_v28  ;;  %v1732_v7 = vsub.f32 1.0, %v1731_v4  ;;  %v4945_v29 = vld [vmem:[%s4840_s24] sm:$0xff]  ;;  %s5261_s24 = sld [smem:[#allocation66_spill]] }
 0x4fe   : > { %v3238_v4 = vld [vmem:[#allocation17 + $0x78] sm:$0xf0] }
 0x4ff   : > { %v1733_v11 = vmul.f32 %v3789_v0, %v1732_v7  ;;  %v3241_v6 = vor.u32 %v3477_v3, %v3238_v4  ;;  %v3230_v7 = vld [vmem:[#allocation17 + $0x68] sm:$0xf0] }
 0x500   : > { %1869 = vmatpush.bf16.msrb.mxu1 %v3460_v31  ;;  %v3463_v31 = vld [vmem:[#allocation17 + $0x4] sm:$0xf] }
 0x501   : > { %v1734_v16 = vadd.f32 %v3789_v0, %v1733_v11  ;;  %1985 = vmatpush.bf16.msrb.mxu3 %v3241_v6  ;;  %v3473_v11 = vld [vmem:[#allocation17 + $0x54] sm:$0xf] }
 0x503   : > { %v4941_v20 = vsel %vm1735_vm2, %v3789_v0, %v1734_v16  ;;  %v3471_v16 = vld [vmem:[#allocation17 + $0x44] sm:$0xf] }
 0x509   : > { %v1586_v32 = vpop.permute.xlu1 %1585 }
 0x50a   : > { %1598 = vmatpush.bf16.msra.mxu0 %v1586_v32  ;;  %v3459_v32 = vld [vmem:[#allocation16 + $0x20] sm:$0xff] }
 0x50b   : > { %1870 = vmatpush.bf16.msrb.mxu1 %v3459_v32  ;;  %v3182_v32 = vld [vmem:[#allocation17 + $0x8] sm:$0xf0] }
 0x50d   : > { %3121 = vmatmul.msk.bf16.vlgmr.msra.gmra.mxu0 %vm1402_vm1, %v1584_v14  ;;  %v3458_v14 = vld [vmem:[#allocation16 + $0x18] sm:$0xff] }
 0x50e   : > { %1712 = vmatpush.bf16.msrb.mxu0 %v3454_v33  ;;  %v3457_v33 = vld [vmem:[#allocation16 + $0x10] sm:$0xff] }
 0x50f   : > { %1871 = vmatpush.bf16.msrb.mxu1 %v3458_v14  ;;  %v3185_v14 = vor.u32 %v3463_v31, %v3182_v32 }
 0x512   : > { %1713 = vmatpush.bf16.msrb.mxu0 %v3453_v34  ;;  %v3456_v34 = vld [vmem:[#allocation16 + $0x8] sm:$0xff] }
 0x513   : > { %1872 = vmatpush.bf16.msrb.mxu1 %v3457_v33 }
 0x517   : > { %1873 = vmatpush.bf16.msrb.mxu1 %v3456_v34 }
 0x51b   : > { %1874 = vmatpush.bf16.msrb.mxu1 %v3455_v35 }
 0x574   : > { %v1516_v37 = vpop.f32.mrf.mxu1 }
 0x575   : > { %v1545_v47 = vadd.f32 %v4920_v55, %v1516_v37  ;;  %v3476_v55 = vld [vmem:[#allocation17 + $0x64] sm:$0xf0] }
 0x576   : > { %v3229_v63 = vor.u32 %v3476_v55, %v3228_v61 }
 0x578   : > { %1972 = vmatpush.bf16.msrb.mxu2 %v3229_v63 }
 0x57c   : > { %v1518_v38 = vpop.f32.mrf.mxu1  ;;  %1973 = vmatpush.bf16.msrb.mxu2 %v3221_v53  ;;  %v3475_v53 = vld [vmem:[#allocation17 + $0x64] sm:$0xf] }
 0x57d   : > { %v3233_v9 = vor.u32 %v3475_v53, %v3230_v7 }
 0x57f   : > { %1986 = vmatpush.bf16.msrb.mxu3 %v3233_v9 }
 0x580   : > { %v1686_v39 = vpop.f32.mrf.mxu3  ;;  %1974 = vmatpush.bf16.msrb.mxu2 %v3213_v8 }
 0x581   : > { %v1690_v40 = vpack.c.bf16 %v1686_v39, %v1686_v39 }
 0x583   : > { %3141 = vmatmul.msk.bf16.vlgmr.msrb.gmra.mxu0 %vm1380_vm0, %v1690_v40 }
 0x584   : > { %1975 = vmatpush.bf16.msrb.mxu2 %v3205_v12  ;;  %v3222_v12 = vld [vmem:[#allocation17 + $0x58] sm:$0xf0] }
 0x585   : > { %v3225_v15 = vor.u32 %v3473_v11, %v3222_v12 }
 0x587   : > { %1987 = vmatpush.bf16.msrb.mxu3 %v3225_v15 }
 0x588   : > { %v1688_v41 = vpop.f32.mrf.mxu3  ;;  %1976 = vmatpush.bf16.msrb.mxu2 %v3197_v17  ;;  %v3214_v17 = vld [vmem:[#allocation17 + $0x48] sm:$0xf0] }
 0x589   : > { %v3217_v19 = vor.u32 %v3471_v16, %v3214_v17 }
 0x58a   : > { %v1600_v42 = vpop.f32.mrf.mxu0 }
 0x58b   : > { %v1604_v43 = vpack.c.bf16 %v1600_v42, %v1600_v42  ;;  %1988 = vmatpush.bf16.msrb.mxu3 %v3217_v19 }
 0x58c   : > { %1977 = vmatpush.bf16.msrb.mxu2 %v3189_v21  ;;  %v3469_v21 = vld [vmem:[#allocation17 + $0x34] sm:$0xf] }
 0x58d   : > { %3130 = vmatmul.msk.bf16.vlgmr.msra.gmra.mxu1 %vm1380_vm0, %v1604_v43  ;;  %v3209_v23 = vor.u32 %v3469_v21, %v3206_v22 }
 0x58f   : > { %1989 = vmatpush.bf16.msrb.mxu3 %v3209_v23 }
 0x590   : > { %1978 = vmatpush.bf16.msrb.mxu2 %v3181_v26 }
 0x592   : > { %v1602_v44 = vpop.f32.mrf.mxu0 }
 0x593   : > { %1979 = vmatmul.bf16.vlgmr.msrb.gmra.mxu2 %v4945_v29 }
 0x600   : > { %v1715_v45 = vpop.f32.mrf.mxu0 }
 0x608   : > { %v1717_v46 = vpop.f32.mrf.mxu0 }
 0x60a   : > { %v1629_v48 = vpop.f32.mrf.mxu1 }
 0x60b   : > { %v1633_v49 = vadd.f32 %v1629_v48, %v1545_v47  ;;  %v3763_v48 = vld [vmem:[%s5256_s27] ss:$0 sm:$0xff] }
 0x60d   : > { %v1719_v52 = vadd.f32 %v1715_v45, %v1633_v49  ;;  %v3762_v45 = vld [vmem:[%s5255_s18] ss:$0 sm:$0xff]  ;;  %s2717_s18 = sshll.u32 %s1122_s26, 4  ;;  %s2718_s18 = int_to_ptr.vmem [resolvable:$true] %s2717_s18 }
 0x60f   : > { %v1723_v54 = vadd.f32 %v3761_v50, %v1719_v52  ;;  %v4962_v52 = vld [vmem:[%s5257_s6] sm:$0x3]  ;;  %s3415_s6 = sshll.u32 %s5252_s0, 1 }
 0x610   : > { %s2713_s22 = sadd.s32 %s5250_s3, %s3415_s6  ;;  %s5267_s3 = sld [smem:[#allocation73_spill]] }
 0x611   : > { %v1725_v56 = vadd.f32 %v1724_v51, %v1723_v54  ;;  %s3416_s8 = sshll.u32 %s2713_s22, 2 }
 0x612   : > { %v1631_v57 = vpop.f32.mrf.mxu1 }
 0x613   : > { %1728 = vadd.xlane.f32.xlu2 %v1725_v56 }
 0x616   : > { %v1980_v54 = vpop.f32.mrf.mxu2  ;;  %s4222_s22 = scalar_lea.hbm %s5267_s3, 16 }
 0x61e   : > { %v1982_v58 = vpop.f32.mrf.mxu2 }
 0x686   : > { %v1729_v24 = vpop.xlane.xlu2 %1728 }
 0x687   : > { %v1737_v25 = vmul.f32 %v4941_v20, %v1729_v24  ;;  %v3467_v24 = vld [vmem:[#allocation17 + $0x24] sm:$0xf] }
 0x689   : > { %v1738_v27 = vsub.f32 %v1725_v56, %v1737_v25  ;;  %v1881_v56 = vperm.slane %v4962_v52, 0  ;;  %v3198_v25 = vld [vmem:[#allocation17 + $0x28] sm:$0xf0] }
 0x68a   : > { %v3201_v26 = vor.u32 %v3467_v24, %v3198_v25 }
 0x68b   : > { %v1739_v28 = vmul.f32 %v1738_v27, %v1738_v27  ;;  %v1981_v57 = vadd.f32 %v1980_v54, %v1881_v56  ;;  %v1983_v59 = vadd.f32 %v1982_v58, %v1881_v56 }
 0x68c   : > { %1990 = vmatpush.bf16.msrb.mxu3 %v3201_v26 }
 0x68d   : > { %1740 = vadd.xlane.f32.xlu0 %v1739_v28  ;;  %v2000_v60 = vpack.c.bf16 %v1983_v59, %v1981_v57  ;;  %v3190_v28 = vld [vmem:[#allocation17 + $0x18] sm:$0xf0] }
 0x68f   : > { %v2006_v61 = vsel %vm1380_vm0, %v2000_v60, 0 }
 0x690   : > { %2015 = vmatpush.bf16.xpose.msra.mxu0 %v2006_v61 }
 0x700   : > { %v1741_v36 = vpop.xlane.xlu0 %1740 }
 0x701   : > { %v1742_v37 = vmul.f32 %v1741_v36, %v4941_v20 }
 0x703   : > { %v1743_v38 = vadd.f32 1e-05, %v1742_v37 }
 0x705   : > { %3790 = vrsqrt.f32 %v1743_v38  ;;  %vm1750_vm4 = vweird.f32 %v1743_v38 }
 0x70b   : > { %v3791_v39 = vpop.eup %3790 }
 0x70c   : > { %v1745_v40 = vmul.f32 %v3791_v39, %v1743_v38  ;;  %vm1751_vm3 = vweird.f32 %v3791_v39 }
 0x70d   : > { %vm1752_vm5 = vmor %vm1750_vm4, %vm1751_vm3 }
 0x70e   : > { %v1746_v41 = vmul.f32 %v3791_v39, %v1745_v40 }
 0x710   : > { %v1747_v42 = vmul.f32 0.5, %v1746_v41 }
 0x712   : > { %v1748_v43 = vsub.f32 1.5, %v1747_v42 }
 0x714   : > { %v1749_v44 = vmul.f32 %v3791_v39, %v1748_v43 }
 0x716   : > { %v1753_v46 = vsel %vm1752_vm5, %v3791_v39, %v1749_v44  ;;  %v1882_v39 = vperm.slane %v4962_v52, 1  ;;  %v3479_v44 = vld [vmem:[#allocation19] sm:$0xff] }
 0x717   : > { %v1754_v47 = vmul.f32 %v1753_v46, %v1738_v27  ;;  %v3465_v27 = vld [vmem:[#allocation17 + $0x14] sm:$0xf] }
 0x718   : > { %v3193_v30 = vor.u32 %v3465_v27, %v3190_v28 }
 0x719   : > { %v1758_v49 = vmul.f32 %v3762_v45, %v1754_v47 }
 0x71a   : > { %1991 = vmatpush.bf16.msrb.mxu3 %v3193_v30 }
 0x71b   : > { %v4955_v50 = vadd.f32 %v3763_v48, %v1758_v49 }
 0x71d   : > { %v1763_v51 = vpack.c.bf16 %v4955_v50, %v4955_v50 }
 0x71e   : > { %1992 = vmatpush.bf16.msrb.mxu3 %v3185_v14 }
 0x71f   : > { %1875 = vmatmul.bf16.vlgmr.msrb.gmra.mxu1 %v1763_v51 }
 0x721   : > { %1993 = vmatmul.bf16.vlgmr.msrb.gmra.mxu3 %v4945_v29  ;;  %v3480_v29 = vld [vmem:[#allocation19 + $0x8] sm:$0xff] }
 0x79c   : > { %v1876_v55 = vpop.f32.mrf.mxu1 }
 0x79d   : > { %v1877_v63 = vadd.f32 %v3764_v62, %v1876_v55 }
 0x79f   : > { %v1999_v0 = vpack.c.bf16 %v1877_v63, %v1877_v63 }
 0x7a1   : > { %2056 = vrot.lane.b32.xlu0 %v1999_v0, %s4396_s17  ;;  %3242 = vmatmul.msk.bf16.vlgmr.msra.gmra.mxu0 %vm1380_vm0, %v1999_v0 }
 0x7a4   : > { %v1878_v1 = vpop.f32.mrf.mxu1  ;;  %v1994_v38 = vpop.f32.mrf.mxu3 }
 0x7a5   : > { %v1995_v40 = vadd.f32 %v1994_v38, %v1882_v39 }
 0x7a9   : > { %2171 = vrot.lane.b32.xlu0 %v1999_v0, %s4397_s21 }
 0x7ac   : > { %v1996_v41 = vpop.f32.mrf.mxu3 }
 0x7ad   : > { %v1997_v42 = vadd.f32 %v1996_v41, %v1882_v39 }
 0x7af   : > { %v4985_v43 = vpack.c.bf16 %v1997_v42, %v1995_v40 }
 0x7b1   : > { %2257 = vrot.lane.b32.xlu0 %v1999_v0, %s4395_s14  ;;  %2048 = vmatpush.bf16.msrb.mxu0 %v4985_v43 }
 0x7b5   : > { %2164 = vmatpush.bf16.msra.mxu0 %v3480_v29  ;;  %v3481_v29 = vld [vmem:[#allocation19 + $0x10] sm:$0xff] }
 0x7b9   : > { %2165 = vmatpush.bf16.msra.mxu0 %v3479_v44  ;;  %v3484_v44 = vld [vmem:[#allocation19 + $0x28] sm:$0xff] }
 0x813   : > { %v2057_v56 = vpop.permute.xlu0 %2056 }
 0x81b   : > { %v2172_v59 = vpop.permute.xlu0 %2171 }
 0x81e   : > { %v2017_v5 = vpop.f32.mrf.mxu0 }
 0x81f   : > { %v2021_v8 = vmul.f32 0.17677669, %v2017_v5 }
 0x821   : > { %v2025_v10 = vadd.f32 %v4975_v2, %v2021_v8 }
 0x823   : > { %v2026_v13 = vsel %vm1402_vm1, %v2025_v10, -inf  ;;  %v2258_v4 = vpop.permute.xlu0 %2257 }
 0x824   : > { %2027 = vmax.xlane.f32.xlu1 %v2026_v13 }
 0x826   : > { %v2019_v18 = vpop.f32.mrf.mxu0 }
 0x83d   : > { %2173 = vrot.lane.b32.xlu1 %v2000_v60, %s4397_s21 }
 0x897   : > { %v2028_v33 = vpop.xlane.xlu1 %2027 }
 0x898   : > { %v2029_v34 = vsub.f32 %v2025_v10, %v2028_v33 }
 0x89a   : > { %v2030_v35 = vmul.f32 1.442695, %v2029_v34 }
 0x89c   : > { %3792 = vpow2.f32 %v2030_v35  ;;  %v3482_v35 = vld [vmem:[#allocation19 + $0x18] sm:$0xff] }
 0x89d   : > { %2136 = vmatpush.bf16.msra.mxu3 %v3482_v35  ;;  %v3495_v35 = vld [vmem:[#allocation20 + $0x44] sm:$0xf] }
 0x8a1   : > { %2137 = vmatpush.bf16.msra.mxu3 %v3481_v29  ;;  %v3314_v29 = vld [vmem:[#allocation20 + $0x38] sm:$0xf0] }
 0x8a2   : > { %v3793_v36 = vpop.eup %3792 }
 0x8a3   : > { %v2032_v37 = vsel %vm1402_vm1, %v3793_v36, 0.0 }
 0x8a4   : > { %2033 = vadd.xlane.f32.xlu2 %v2032_v37 }
 0x8a5   : > { %2249 = vmatpush.bf16.msrb.mxu3 %v3484_v44 }
 0x8af   : > { %v2174_v47 = vpop.permute.xlu1 %2173 }
 0x8b0   : > { %v2179_v52 = vsel %vm1380_vm0, %v2174_v47, 0 }
 0x8bc   : > { %2059 = vrot.lane.b32.xlu2 %v2000_v60, %s4396_s17 }
 0x8c4   : > { %2259 = vrot.lane.b32.xlu2 %v2000_v60, %s4395_s14 }
 0x917   : > { %v2034_v45 = vpop.xlane.xlu2 %2033 }
 0x918   : > { %3794 = vrcp.f32 %v2034_v45 }
 0x91e   : > { %v3795_v46 = vpop.eup %3794 }
 0x91f   : > { %v2036_v48 = vmul.f32 %v3795_v46, %v3793_v36  ;;  %v2060_v49 = vpop.permute.xlu2 %2059  ;;  %v3483_v46 = vld [vmem:[#allocation19 + $0x20] sm:$0xff] }
 0x920   : > { %v2065_v51 = vsel %vm1380_vm0, %v2060_v49, 0  ;;  %2250 = vmatpush.bf16.msrb.mxu3 %v3483_v46  ;;  %v3492_v46 = vld [vmem:[#allocation20 + $0x24] sm:$0xf0] }
 0x921   : > { %v2037_v54 = vpack.c.bf16 %v2036_v48, %v2036_v48  ;;  %2074 = vmatpush.bf16.xpose.msra.mxu1 %v2065_v51 }
 0x923   : > { %3243 = vmatmul.msk.bf16.vlgmr.msrb.gmra.mxu0 %vm1402_vm1, %v2037_v54 }
 0x927   : > { %v2260_v57 = vpop.permute.xlu2 %2259 }
 0x928   : > { %v2265_v58 = vsel %vm1380_vm0, %v2260_v57, 0  ;;  %3244 = vmatmul.msk.bf16.vlgmr.msra.gmra.mxu1 %vm1380_vm0, %v2057_v56  ;;  %v3486_v56 = vld [vmem:[#allocation19 + $0x38] sm:$0xff] }
 0x929   : > { %2188 = vmatpush.bf16.xpose.msrb.mxu1 %v2179_v52  ;;  %2274 = vmatpush.bf16.xpose.msrb.mxu0 %v2265_v58 }
 0x938   : > { %3264 = vmatmul.msk.bf16.vlgmr.msrb.gmra.mxu1 %vm1380_vm0, %v2172_v59 }
 0x9a0   : > { %v2050_v60 = vpop.f32.mrf.mxu0 }
 0x9a1   : > { %v2054_v61 = vpack.c.bf16 %v2050_v60, %v2050_v60  ;;  %v3485_v60 = vld [vmem:[#allocation19 + $0x30] sm:$0xff] }
 0x9a3   : > { %3263 = vmatmul.msk.bf16.vlgmr.msra.gmra.mxu0 %vm1380_vm0, %v2054_v61 }
 0x9a5   : > { %v2076_v62 = vpop.f32.mrf.mxu1 }
 0x9a6   : > { %v2080_v55 = vmul.f32 0.17677669, %v2076_v62 }
 0x9a8   : > { %v2052_v63 = vpop.f32.mrf.mxu0  ;;  %v2081_v0 = vadd.f32 %v4975_v2, %v2080_v55 }
 0x9aa   : > { %v2082_v1 = vsel %vm1402_vm1, %v2081_v0, -inf }
 0x9ab   : > { %2083 = vmax.xlane.f32.xlu2 %v2082_v1 }
 0x9ad   : > { %v2078_v3 = vpop.f32.mrf.mxu1 }
 0x9b3   : > { %3275 = vmatmul.msk.bf16.vlgmr.msrb.gmra.mxu0 %vm1380_vm0, %v2258_v4 }
 0x9b5   : > { %v2190_v53 = vpop.f32.mrf.mxu1 }
 0x9b6   : > { %v2194_v5 = vmul.f32 0.17677669, %v2190_v53 }
 0x9b8   : > { %v2195_v6 = vadd.f32 %v4975_v2, %v2194_v5 }
 0x9ba   : > { %v2196_v7 = vsel %vm1402_vm1, %v2195_v6, -inf }
 0x9bb   : > { %2197 = vmax.xlane.f32.xlu1 %v2196_v7 }
 0x9bd   : > { %v2192_v8 = vpop.f32.mrf.mxu1 }
 0x9d4   : > { %2095 = vrot.lane.b32.xlu1 %v4985_v43, %s4396_s17  ;;  %s5265_s17 = sld [smem:[#allocation71_spill]] }
 0xa1e   : > { %v2084_v9 = vpop.xlane.xlu2 %2083 }
 0xa1f   : > { %v2085_v10 = vsub.f32 %v2081_v0, %v2084_v9 }
 0xa20   : > { %v5002_v11 = vpop.f32.mrf.mxu0 }
 0xa21   : > { %v2086_v12 = vmul.f32 1.442695, %v2085_v10 }
 0xa23   : > { %3796 = vpow2.f32 %v2086_v12  ;;  %v3344_v12 = vld [vmem:[#allocation20 + $0x70] sm:$0xf] }
 0xa28   : > { %v2169_v13 = vpop.f32.mrf.mxu0 }
 0xa29   : > { %v3797_v15 = vpop.eup %3796  ;;  %v3502_v13 = vld [vmem:[#allocation20 + $0x74] sm:$0xf0] }
 0xa2a   : > { %v2088_v16 = vsel %vm1402_vm1, %v3797_v15, 0.0 }
 0xa2b   : > { %2089 = vadd.xlane.f32.xlu2 %v2088_v16  ;;  %v3345_v16 = vor.u32 %v3502_v13, %v3344_v12 }
 0xa2e   : > { %v2198_v17 = vpop.xlane.xlu1 %2197 }
 0xa2f   : > { %v2199_v18 = vsub.f32 %v2195_v6, %v2198_v17  ;;  %v3346_v17 = vld [vmem:[#allocation20 + $0x78] sm:$0xf0] }
 0xa30   : > { %v2276_v19 = vpop.f32.mrf.mxu0 }
 0xa31   : > { %v2200_v21 = vmul.f32 1.442695, %v2199_v18  ;;  %v2280_v22 = vmul.f32 0.17677669, %v2276_v19 }
 0xa33   : > { %v2281_v23 = vadd.f32 %v4975_v2, %v2280_v22  ;;  %3798 = vpow2.f32 %v2200_v21 }
 0xa35   : > { %v2282_v24 = vsel %vm1402_vm1, %v2281_v23, -inf }
 0xa36   : > { %2283 = vmax.xlane.f32.xlu0 %v2282_v24  ;;  %v3499_v24 = vld [vmem:[#allocation20 + $0x64] sm:$0xf] }
 0xa38   : > { %v2278_v25 = vpop.f32.mrf.mxu0 }
 0xa39   : > { %v3799_v26 = vpop.eup %3798 }
 0xa3a   : > { %v2202_v27 = vsel %vm1402_vm1, %v3799_v26, 0.0 }
 0xa3e   : > { %2203 = vadd.xlane.f32.xlu0 %v2202_v27 }
 0xa46   : > { %v2096_v28 = vpop.permute.xlu1 %2095 }
 0xa47   : > { %2108 = vmatpush.bf16.msra.mxu2 %v2096_v28  ;;  %v3328_v28 = vld [vmem:[#allocation20 + $0x50] sm:$0xf] }
 0xa52   : > { %2208 = vrot.lane.b32.xlu0 %v4985_v43, %s4397_s21 }
 0xa9e   : > { %v2090_v30 = vpop.xlane.xlu2 %2089 }
 0xa9f   : > { %3800 = vrcp.f32 %v2090_v30  ;;  %v3498_v30 = vld [vmem:[#allocation20 + $0x54] sm:$0xf0] }
 0xaa5   : > { %v3801_v31 = vpop.eup %3800 }
 0xaa6   : > { %v2092_v32 = vmul.f32 %v3801_v31, %v3797_v15  ;;  %v3501_v15 = vld [vmem:[#allocation20 + $0x74] sm:$0xf] }
 0xaa7   : > { %v3497_v31 = vld [vmem:[#allocation20 + $0x54] sm:$0xf] }
 0xaa8   : > { %v2093_v14 = vpack.c.bf16 %v2092_v32, %v2092_v32  ;;  %v3329_v32 = vor.u32 %v3498_v30, %v3328_v28  ;;  %v3512_v30 = vld [vmem:[#allocation22 + $0x48] sm:$0xff] }
 0xaa9   : > { %v2284_v2 = vpop.xlane.xlu0 %2283 }
 0xaaa   : > { %v2285_v33 = vsub.f32 %v2281_v23, %v2284_v2  ;;  %3245 = vmatmul.msk.bf16.vlgmr.msra.gmra.mxu2 %vm1402_vm1, %v2093_v14  ;;  %v3500_v23 = vld [vmem:[#allocation20 + $0x64] sm:$0xf0]  ;;  %v3330_v14 = vld [vmem:[#allocation20 + $0x58] sm:$0xf0] }
 0xaab   : > { %v3333_v2 = vor.u32 %v3497_v31, %v3330_v14  ;;  %v3505_v31 = vld [vmem:[#allocation22 + $0x10] sm:$0xff]  ;;  %v3504_v14 = vld [vmem:[#allocation22 + $0x8] sm:$0xff] }
 0xaac   : > { %v2286_v34 = vmul.f32 1.442695, %v2285_v33  ;;  %v3320_v33 = vld [vmem:[#allocation20 + $0x40] sm:$0xf] }
 0xaae   : > { %3802 = vpow2.f32 %v2286_v34  ;;  %v3496_v34 = vld [vmem:[#allocation20 + $0x44] sm:$0xf0] }
 0xab1   : > { %v2204_v38 = vpop.xlane.xlu0 %2203 }
 0xab2   : > { %3804 = vrcp.f32 %v2204_v38 }
 0xab4   : > { %v3803_v36 = vpop.eup %3802 }
 0xab5   : > { %v2288_v37 = vsel %vm1402_vm1, %v3803_v36, 0.0 }
 0xab6   : > { %2289 = vadd.xlane.f32.xlu2 %v2288_v37  ;;  %v3322_v37 = vld [vmem:[#allocation20 + $0x48] sm:$0xf0] }
 0xab7   : > { %v3325_v38 = vor.u32 %v3495_v35, %v3322_v37 }
 0xab8   : > { %v3805_v39 = vpop.eup %3804 }
 0xab9   : > { %v2206_v40 = vmul.f32 %v3805_v39, %v3799_v26  ;;  %v3338_v26 = vld [vmem:[#allocation20 + $0x68] sm:$0xf0]  ;;  %v3312_v39 = vld [vmem:[#allocation20 + $0x30] sm:$0xf] }
 0xaba   : > { %v3341_v27 = vor.u32 %v3499_v24, %v3338_v26 }
 0xabb   : > { %v2207_v42 = vpack.c.bf16 %v2206_v40, %v2206_v40  ;;  %v3494_v40 = vld [vmem:[#allocation20 + $0x34] sm:$0xf0] }
 0xac4   : > { %v2209_v41 = vpop.permute.xlu0 %2208 }
 0xac5   : > { %2221 = vmatpush.bf16.msrb.mxu2 %v2209_v41  ;;  %v3493_v41 = vld [vmem:[#allocation20 + $0x34] sm:$0xf] }
 0xac6   : > { %v3317_v44 = vor.u32 %v3493_v41, %v3314_v29 }
 0xac8   : > { %3265 = vmatmul.msk.bf16.vlgmr.msrb.gmra.mxu2 %vm1402_vm1, %v2207_v42  ;;  %v3313_v42 = vor.u32 %v3494_v40, %v3312_v39 }
 0xac9   : > { %2335 = vmatpush.bf16.msra.mxu2 %v3486_v56  ;;  %v3489_v56 = vld [vmem:[#allocation20 + $0x14] sm:$0xf] }
 0xacd   : > { %2336 = vmatpush.bf16.msra.mxu2 %v3485_v60 }
 0xace   : > { %2294 = vrot.lane.b32.xlu2 %v4985_v43, %s4395_s14  ;;  %s5259_s14 = sld [smem:[#allocation64_spill]] }
 0xad4   : > { %v3766_v5 = vld [vmem:[%s5259_s14] ss:$0 sm:$0xff] }
 0xb29   : > { %v2290_v45 = vpop.xlane.xlu2 %2289 }
 0xb2a   : > { %3806 = vrcp.f32 %v2290_v45  ;;  %v3304_v45 = vld [vmem:[#allocation20 + $0x20] sm:$0xf] }
 0xb2d   : > { %v2110_v47 = vpop.f32.mrf.mxu2 }
 0xb2e   : > { %v2114_v48 = vpack.c.bf16 %v2110_v47, %v2110_v47  ;;  %v3491_v47 = vld [vmem:[#allocation20 + $0x24] sm:$0xf] }
 0xb30   : > { %v3807_v49 = vpop.eup %3806  ;;  %3254 = vmatmul.msk.bf16.vlgmr.msra.gmra.mxu3 %vm1380_vm0, %v2114_v48  ;;  %v3305_v48 = vor.u32 %v3492_v46, %v3304_v45  ;;  %v3769_v45 = vld [vmem:[%s5263_s13] ss:$0 sm:$0xff] }
 0xb31   : > { %v2292_v51 = vmul.f32 %v3807_v49, %v3803_v36  ;;  %v2295_v52 = vpop.permute.xlu2 %2294  ;;  %2481 = vmatpush.bf16.msra.mxu3 %v3345_v16  ;;  %v3321_v36 = vor.u32 %v3496_v34, %v3320_v33  ;;  %v3306_v49 = vld [vmem:[#allocation20 + $0x28] sm:$0xf0]  ;;  %v3506_v16 = vld [vmem:[#allocation22 + $0x18] sm:$0xff] }
 0xb32   : > { %2307 = vmatpush.bf16.msra.mxu1 %v2295_v52  ;;  %v3296_v52 = vld [vmem:[#allocation20 + $0x10] sm:$0xf] }
 0xb33   : > { %v2293_v54 = vpack.c.bf16 %v2292_v51, %v2292_v51  ;;  %v3309_v51 = vor.u32 %v3491_v47, %v3306_v49 }
 0xb35   : > { %v2112_v57 = vpop.f32.mrf.mxu2  ;;  %3276 = vmatmul.msk.bf16.vlgmr.msra.gmra.mxu1 %vm1402_vm1, %v2293_v54  ;;  %v3490_v54 = vld [vmem:[#allocation20 + $0x14] sm:$0xf0] }
 0xb36   : > { %v3297_v57 = vor.u32 %v3490_v54, %v3296_v52 }
 0xb4b   : > { %v2223_v43 = vpop.f32.mrf.mxu2 }
 0xb4c   : > { %v2227_v58 = vpack.c.bf16 %v2223_v43, %v2223_v43  ;;  %v3298_v43 = vld [vmem:[#allocation20 + $0x18] sm:$0xf0] }
 0xb4d   : > { %v3301_v60 = vor.u32 %v3489_v56, %v3298_v43 }
 0xb4e   : > { %3274 = vmatmul.msk.bf16.vlgmr.msrb.gmra.mxu3 %vm1380_vm0, %v2227_v58  ;;  %v3288_v58 = vld [vmem:[#allocation20] sm:$0xf] }
 0xb53   : > { %v2225_v59 = vpop.f32.mrf.mxu2 }
 0xb54   : > { %v3488_v59 = vld [vmem:[#allocation20 + $0x4] sm:$0xf0] }
 0xbb2   : > { %v2309_v61 = vpop.f32.mrf.mxu1 }
 0xbb3   : > { %v2313_v62 = vpack.c.bf16 %v2309_v61, %v2309_v61  ;;  %v2139_v55 = vpop.f32.mrf.mxu3  ;;  %v3487_v61 = vld [vmem:[#allocation20 + $0x4] sm:$0xf] }
 0xbb4   : > { %v2168_v1 = vadd.f32 %v5002_v11, %v2139_v55  ;;  %v3349_v11 = vor.u32 %v3501_v15, %v3346_v17  ;;  %v3289_v55 = vor.u32 %v3488_v59, %v3288_v58  ;;  %v3514_v15 = vld [vmem:[#allocation22 + $0x58] sm:$0xff] }
 0xbb5   : > { %3285 = vmatmul.msk.bf16.vlgmr.msra.gmra.mxu2 %vm1380_vm0, %v2313_v62  ;;  %v3290_v62 = vld [vmem:[#allocation20 + $0x8] sm:$0xf0] }
 0xbb6   : > { %2494 = vmatpush.bf16.msra.mxu0 %v3349_v11 }
 0xbba   : > { %v2311_v63 = vpop.f32.mrf.mxu1  ;;  %2495 = vmatpush.bf16.msra.mxu0 %v3341_v27 }
 0xbbb   : > { %v2141_v0 = vpop.f32.mrf.mxu3  ;;  %v3293_v63 = vor.u32 %v3487_v61, %v3290_v62 }
 0xbbc   : > { %v3518_v0 = vld [vmem:[#allocation22 + $0x78] sm:$0xff] }
 0xbbd   : > { %2656 = vmatpush.bf16.msrb.mxu2 %v3518_v0 }
 0xbbe   : > { %2496 = vmatpush.bf16.msra.mxu0 %v3333_v2  ;;  %v3503_v2 = vld [vmem:[#allocation22] sm:$0xff] }
 0xbc2   : > { %2497 = vmatpush.bf16.msra.mxu0 %v3325_v38 }
 0xbc6   : > { %2498 = vmatpush.bf16.msra.mxu0 %v3317_v44 }
 0xbca   : > { %2499 = vmatpush.bf16.msra.mxu0 %v3309_v51 }
 0xbce   : > { %2500 = vmatpush.bf16.msra.mxu0 %v3301_v60 }
 0xbd1   : > { %v2252_v3 = vpop.f32.mrf.mxu3 }
 0xbd2   : > { %v2256_v4 = vadd.f32 %v2252_v3, %v2168_v1  ;;  %2501 = vmatpush.bf16.msra.mxu0 %v3293_v63  ;;  %v3510_v1 = vld [vmem:[#allocation22 + $0x38] sm:$0xff] }
 0xbd3   : > { %2643 = vmatpush.bf16.msrb.mxu1 %v3510_v1 }
 0xbd9   : > { %v2254_v53 = vpop.f32.mrf.mxu3 }
 0xbda   : > { %v3517_v53 = vld [vmem:[#allocation22 + $0x70] sm:$0xff] }
 0xbdb   : > { %2657 = vmatpush.bf16.msrb.mxu2 %v3517_v53 }
 0xc38   : > { %v2338_v6 = vpop.f32.mrf.mxu2 }
 0xc39   : > { %v2342_v7 = vadd.f32 %v2338_v6, %v2256_v4 }
 0xc3b   : > { %v2346_v8 = vadd.f32 %v3766_v5, %v2342_v7  ;;  %v3509_v5 = vld [vmem:[#allocation22 + $0x30] sm:$0xff]  ;;  %v3516_v7 = vld [vmem:[#allocation22 + $0x68] sm:$0xff] }
 0xc3c   : > { %2644 = vmatpush.bf16.msrb.mxu1 %v3509_v5  ;;  %2658 = vmatpush.bf16.msrb.mxu2 %v3516_v7  ;;  %v3771_v5 = vld [vmem:[%s5266_s30] ss:$0 sm:$0xff] }
 0xc3d   : > { %v2347_v9 = vadd.f32 %v2346_v8, %v4955_v50  ;;  %v3336_v50 = vld [vmem:[#allocation20 + $0x60] sm:$0xf]  ;;  %v3508_v8 = vld [vmem:[#allocation22 + $0x28] sm:$0xff] }
 0xc3e   : > { %v3337_v25 = vor.u32 %v3500_v23, %v3336_v50  ;;  %v3767_v50 = vld [vmem:[%s5260_s28] ss:$0 sm:$0xff] }
 0xc3f   : > { %2350 = vadd.xlane.f32.xlu1 %v2347_v9 }
 0xc40   : > { %v2340_v10 = vpop.f32.mrf.mxu2  ;;  %2482 = vmatpush.bf16.msra.mxu3 %v3337_v25  ;;  %2645 = vmatpush.bf16.msrb.mxu1 %v3508_v8  ;;  %v3768_v25 = vld [vmem:[%s5261_s24] ss:$0 sm:$0xff]  ;;  %s2715_s24 = scalar_lea.hbm %s5267_s3, %s3416_s8 }
 0xc41   : > { %v3507_v10 = vld [vmem:[#allocation22 + $0x20] sm:$0xff] }
 0xc44   : > { %2483 = vmatpush.bf16.msra.mxu3 %v3329_v32  ;;  %2646 = vmatpush.bf16.msrb.mxu1 %v3507_v10  ;;  %v3511_v32 = vld [vmem:[#allocation22 + $0x40] sm:$0xff] }
 0xc48   : > { %2484 = vmatpush.bf16.msra.mxu3 %v3321_v36  ;;  %2647 = vmatpush.bf16.msrb.mxu1 %v3506_v16 }
 0xc4c   : > { %2485 = vmatpush.bf16.msra.mxu3 %v3313_v42  ;;  %2648 = vmatpush.bf16.msrb.mxu1 %v3505_v31 }
 0xc50   : > { %2486 = vmatpush.bf16.msra.mxu3 %v3305_v48  ;;  %2649 = vmatpush.bf16.msrb.mxu1 %v3504_v14 }
 0xc54   : > { %2487 = vmatpush.bf16.msra.mxu3 %v3297_v57  ;;  %2650 = vmatpush.bf16.msrb.mxu1 %v3503_v2 }
 0xc58   : > { %2488 = vmatpush.bf16.msra.mxu3 %v3289_v55 }
 0xcb2   : > { %v2351_v18 = vpop.xlane.xlu1 %2350 }
 0xcb3   : > { %v2352_v19 = vmul.f32 %v2351_v18, %v4941_v20  ;;  %v3513_v18 = vld [vmem:[#allocation22 + $0x50] sm:$0xff] }
 0xcb5   : > { %v5025_v21 = vsub.f32 %v2347_v9, %v2352_v19  ;;  %v3515_v9 = vld [vmem:[#allocation22 + $0x60] sm:$0xff] }
 0xcb6   : > { %2659 = vmatpush.bf16.msrb.mxu2 %v3515_v9 }
 0xcb7   : > { %v2354_v22 = vmul.f32 %v5025_v21, %v5025_v21 }
 0xcb9   : > { %2355 = vadd.xlane.f32.xlu0 %v2354_v22 }
 0xcba   : > { %2660 = vmatpush.bf16.msrb.mxu2 %v3514_v15 }
 0xcbe   : > { %2661 = vmatpush.bf16.msrb.mxu2 %v3513_v18 }
 0xcc2   : > { %2662 = vmatpush.bf16.msrb.mxu2 %v3512_v30 }
 0xcc6   : > { %2663 = vmatpush.bf16.msrb.mxu2 %v3511_v32 }
 0xd2c   : > { %v2356_v3 = vpop.xlane.xlu0 %2355 }
 0xd2d   : > { %v2357_v4 = vmul.f32 %v2356_v3, %v4941_v20 }
 0xd2f   : > { %v2358_v6 = vadd.f32 1e-05, %v2357_v4  ;;  %v3770_v4 = vld [vmem:[%s5265_s17] ss:$0 sm:$0xff] }
 0xd31   : > { %3808 = vrsqrt.f32 %v2358_v6  ;;  %vm2365_vm7 = vweird.f32 %v2358_v6 }
 0xd37   : > { %v3809_v12 = vpop.eup %3808 }
 0xd38   : > { %v2360_v13 = vmul.f32 %v3809_v12, %v2358_v6  ;;  %vm2366_vm6 = vweird.f32 %v3809_v12 }
 0xd39   : > { %vm2367_vm8 = vmor %vm2365_vm7, %vm2366_vm6 }
 0xd3a   : > { %v2361_v17 = vmul.f32 %v3809_v12, %v2360_v13 }
 0xd3c   : > { %v2362_v11 = vmul.f32 0.5, %v2361_v17 }
 0xd3e   : > { %v2363_v19 = vsub.f32 1.5, %v2362_v11 }
 0xd40   : > { %v2364_v22 = vmul.f32 %v3809_v12, %v2363_v19 }
 0xd42   : > { %v2368_v23 = vsel %vm2367_vm8, %v3809_v12, %v2364_v22 }
 0xd43   : > { %v2369_v24 = vmul.f32 %v2368_v23, %v5025_v21  ;;  %v2395_v21 = vld [vmem:[%s5262_s4] sm:$0x3]  ;;  %s2719_s4 = sshll.u32 %s2715_s24, 4  ;;  %s2720_s4 = int_to_ptr.hbm [resolvable:$true] %s2719_s4 }
 0xd44   : > { %v2398_v33 = vperm.slane %v2395_v21, 1  ;;  %v2397_v37 = vperm.slane %v2395_v21, 0  ;;  %s4216_s27 = sshra.s32 %s2720_s4, 4  ;;  %s4217_s27 = int_to_ptr.hbm [resolvable:$true] %s4216_s27 }
 0xd45   : > { %v2373_v26 = vmul.f32 %v3767_v50, %v2369_v24  ;;  %s4218_s13 = scalar_lea.hbm %s4217_s27, 4  ;;  %p4223_p12 = scmp.lt.s32.totalorder %s4217_s27, %s5267_s3 }
 0xd46   : > { %p4219_p7 = scmp.ne.s32.totalorder %s4217_s27, %s4218_s13  ;;  %p4224_p2 = scmp.lt.s32.totalorder %s4222_s22, %s4218_s13 }
 0xd47   : > { %v2377_v27 = vadd.f32 %v3768_v25, %v2373_v26 }
 0xd48   : > { %p4220_p3 = pnand %p4219_p7, %p4800_p6  ;;  %p4225_p8 = por %p4224_p2, %p4223_p12 }
 0xd49   : > { %v2378_v28 = vpack.c.bf16 %v2377_v27, %v2377_v27 }
 0xd4a   : > { %p4221_p9 = pneg %p4220_p3 }
 0xd4b   : > { %2489 = vmatmul.bf16.vlgmr.msra.gmra.mxu3 %v2378_v28  ;;  %2502 = vmatmul.bf16.vlgmr.msra.gmra.mxu0 %v2378_v28 }
 0xd4c   : > { %p4226_p10 = pnand %p4225_p8, %p4221_p9 }
 0xdc8   : > { %v2503_v34 = vpop.f32.mrf.mxu0 }
 0xdc9   : > { %v2504_v35 = vadd.f32 %v2503_v34, %v2398_v33 }
 0xdcb   : > { %v2508_v36 = vmax.f32 %v2504_v35, 0.0 }
 0xdcd   : > { %v2510_v38 = vpack.c.bf16 %v2508_v36, %v2508_v36 }
 0xdce   : > { %v2490_v39 = vpop.f32.mrf.mxu3 }
 0xdcf   : > { %v2491_v40 = vadd.f32 %v2490_v39, %v2397_v37  ;;  %2664 = vmatmul.bf16.vlgmr.msrb.gmra.mxu2 %v2510_v38 }
 0xdd0   : > { %v2505_v41 = vpop.f32.mrf.mxu0 }
 0xdd1   : > { %v2507_v42 = vmax.f32 %v2491_v40, 0.0 }
 0xdd3   : > { %v2509_v29 = vpack.c.bf16 %v2507_v42, %v2507_v42 }
 0xdd5   : > { %2651 = vmatmul.bf16.vlgmr.msrb.gmra.mxu1 %v2509_v29 }
 0xdd6   : > { %v2492_v44 = vpop.f32.mrf.mxu3 }
 0xe52   : > { %v2652_v46 = vpop.f32.mrf.mxu1  ;;  %v2665_v47 = vpop.f32.mrf.mxu2 }
 0xe53   : > { %v2653_v48 = vadd.f32 %v3769_v45, %v2652_v46 }
 0xe55   : > { %v2666_v49 = vadd.f32 %v2665_v47, %v2653_v48 }
 0xe57   : > { %v2669_v51 = vadd.f32 %v2666_v49, %v2377_v27 }
 0xe59   : > { %2672 = vadd.xlane.f32.xlu2 %v2669_v51 }
 0xe5a   : > { %v2654_v52 = vpop.f32.mrf.mxu1  ;;  %v2667_v54 = vpop.f32.mrf.mxu2 }
 0xecc   : > { %v2673_v56 = vpop.xlane.xlu2 %2672 }
 0xecd   : > { %v2674_v57 = vmul.f32 %v2673_v56, %v4941_v20 }
 0xecf   : > { %v2675_v43 = vsub.f32 %v2669_v51, %v2674_v57 }
 0xed1   : > { %v2676_v58 = vmul.f32 %v2675_v43, %v2675_v43 }
 0xed3   : > { %2677 = vadd.xlane.f32.xlu1 %v2676_v58 }
 0xf46   : > { %v2678_v59 = vpop.xlane.xlu1 %2677 }
 0xf47   : > { %v2679_v60 = vmul.f32 %v2678_v59, %v4941_v20 }
 0xf49   : > { %v2680_v61 = vadd.f32 1e-05, %v2679_v60 }
 0xf4b   : > { %3810 = vrsqrt.f32 %v2680_v61  ;;  %vm2687_vm10 = vweird.f32 %v2680_v61 }
 0xf51   : > { %v3811_v62 = vpop.eup %3810 }
 0xf52   : > { %v2682_v55 = vmul.f32 %v3811_v62, %v2680_v61  ;;  %vm2688_vm9 = vweird.f32 %v3811_v62 }
 0xf53   : > { %vm2689_vm11 = vmor %vm2687_vm10, %vm2688_vm9 }
 0xf54   : > { %v2683_v63 = vmul.f32 %v3811_v62, %v2682_v55 }
 0xf56   : > { %v2684_v0 = vmul.f32 0.5, %v2683_v63 }
 0xf58   : > { %v2685_v1 = vsub.f32 1.5, %v2684_v0 }
 0xf5a   : > { %v2686_v3 = vmul.f32 %v3811_v62, %v2685_v1 }
 0xf5c   : > { %v2690_v20 = vsel %vm2689_vm11, %v3811_v62, %v2686_v3 }
 0xf5d   : > { %v2691_v53 = vmul.f32 %v2690_v20, %v2675_v43 }
 0xf5f   : > { %v2695_v6 = vmul.f32 %v3770_v4, %v2691_v53 }
 0xf61   : > { %v2699_v7 = vadd.f32 %v3771_v5, %v2695_v6 }
 0xf63   : > { %v2700_v8 = vpack.c.bf16 %v2699_v7, %v2699_v7 }
 0xf65   : > { %2701 = vst [vmem:[%s1122_s26] sm:$0xf] %v2700_v8 }
 0xf66   : > { %4229 = shalt.err (!%p4226_p10)
}
 0xf67   : > { %3563 = dma.vmem_to_hbm [thread:$0]  (%p4800_p6), %s2718_s18, 64, %s2720_s4, %s2703_s19  }
 0xf68 PF: > { %s5268_s16 = sld [smem:[#allocation34_spill]]  ;;  %p3629_p11 = scmp.ge.s32.totalorder %s4380_s2, 2 }
 0xf6a   : > { %p3607_p13 = pnand %p3629_p11, %p4804_p1 }
 0xf6c   : > { %p3608_p0 = pneg %p3607_p13 }
 0xf6e   : > { %s2731_s12 = sand.u32 1, %s5268_s16  }
 0xf6f   : > { %s2732_s14 = scalar_lea.sflag [#allocation4], %s2731_s12 }
 0xf70   : > { %4323 = dma.done.wait (%p3608_p0), %s2732_s14, 64  }
 0xf71   : > { %4325 = vsyncadd (%p3608_p0), %s2732_s14, 4294967232  ;;  %s53_s2 = sadd.s32 1, %s4380_s2   ;;  %s5270_s7 = sld [smem:[#allocation35_spill]] }
 0xf72   : > { %p5072_p4 = scmp.ge.s32.totalorder %s53_s2, 6   ;;  %s5271_s4 = sld [smem:[#allocation36_spill]] }
 0xf73   : > { %s5272_s28 = sld [smem:[#allocation37_spill]]  ;;  %s5277_s8 = smov %s5293_s15 }
 0xf74   : > { %s5273_s29 = sld [smem:[#allocation45_spill]]  ;;  %s5278_s30 = smov %s4344_s9 }
 0xf75   : > { %s5274_s20 = sld [smem:[#allocation40_spill]]  ;;  %s5279_s9 = smov %s4348_s5 }
 0xf76   : > { %s5275_s6 = sld [smem:[#allocation43_spill]]  ;;  %s5280_s5 = smov %s4776_s25 }
 0xf77   : > { %s5276_s21 = sld [smem:[#allocation44_spill]]  ;;  %s5281_s0 = smov %s4360_s10 }
 0xf78   : > { %s5284_s1 = smov %s4376_s11 }
 0xf79   :  { %52 = sbr.rel (!%p5072_p4) target bundleno = 47 (0x2f), region = 250 }
 0xf7a   : > { %s5282_s10 = smov %s5273_s29 }
 0xf7b   : > { %s5283_s29 = smov %s5274_s20 }
 0xf7d   : > { %s5285_s11 = smov %s5276_s21 }
 0xf7e   :  { %2738 = vsyncpa [#allocation3], 1 }
 0xf7f   :  { %2740 = vsyncpa [#allocation3 + $0x1], 1 }
 0xf80   :  { %2741 = vsyncpa [#allocation6], 1 }
 0xf81   :  { %2743 = vsyncpa [#allocation6 + $0x1], 1 }
 0xf82   :  { %2744 = vsyncpa [#allocation9], 1 }
 0xf83   :  { %2746 = vsyncpa [#allocation9 + $0x1], 1 }
 0xf84   :  { %2747 = vsyncpa [#allocation12], 1 }
 0xf85   :  { %2748 = vsyncpa [#allocation15], 1 }
 0xf86   :  { %2749 = vsyncpa [#allocation18], 1 }
 0xf87   :  { %2750 = vsyncpa [#allocation21], 1 }
 0xf88   :  { %2751 = vsyncpa [#allocation4], 1 }
 0xf89   :  { %2753 = vsyncpa [#allocation4 + $0x1], 1 }

</bundles_post_ra>
